<compile_context>
chip_gen: v5e
topology: v5e:2x2
jax: 0.10.0
libtpu: 0.0.40
codegen_flags: <defaults>
</compile_context>

<pallas_src>
import functools

import jax
import jax.numpy as jnp
import numpy as np
from jax.experimental import pallas as pl
from jax.experimental.pallas import tpu as pltpu


def _round_up(x, m):
    return (x + m - 1) // m * m


# ---------------------------------------------------------------------------
# Pallas kernel: (tm, K) @ (K, OC) + bias + optional LeakyReLU
# ---------------------------------------------------------------------------
def _mm_bias_act_kernel(x_ref, w_ref, b_ref, o_ref, *, apply_lrelu, slope):
    acc = jnp.dot(x_ref[...], w_ref[...], preferred_element_type=jnp.float32)
    acc = acc + b_ref[...]  # (1, OCp) broadcast over rows
    if apply_lrelu:
        acc = jnp.where(acc >= 0, acc, slope * acc)
    o_ref[...] = acc.astype(o_ref.dtype)


def _pallas_matmul_bias_act(patches, w_mat, bias, apply_lrelu, *, slope=0.01,
                            tm_max=256):
    """patches: (M, K) f32, w_mat: (K, OC) f32, bias: (OC,) f32 -> (M, OC)."""
    M, K = patches.shape
    K2, OC = w_mat.shape
    assert K == K2
    Kp = _round_up(K, 128)        # dense lane tiles on the reduction dim
    OCp = _round_up(OC, 128)      # lane-dense output (no masked stores)
    tm = min(tm_max, _round_up(M, 8))
    Mp = _round_up(M, tm)

    xp = jnp.pad(patches, ((0, Mp - M), (0, Kp - K)))
    wp = jnp.pad(w_mat, ((0, Kp - K), (0, OCp - OC)))
    bp = jnp.pad(bias, (0, OCp - OC)).reshape(1, OCp)

    kern = functools.partial(_mm_bias_act_kernel, apply_lrelu=apply_lrelu,
                             slope=slope)
    out = pl.pallas_call(
        kern,
        out_shape=jax.ShapeDtypeStruct((Mp, OCp), jnp.float32),
        grid=(Mp // tm,),
        in_specs=[
            pl.BlockSpec((tm, Kp), lambda i: (i, 0)),
            pl.BlockSpec((Kp, OCp), lambda i: (0, 0)),
            pl.BlockSpec((1, OCp), lambda i: (0, 0)),
        ],
        out_specs=pl.BlockSpec((tm, OCp), lambda i: (i, 0)),
        compiler_params=pltpu.CompilerParams(
            dimension_semantics=("parallel",),
            vmem_limit_bytes=32 * 1024 * 1024,  # safe on v5e/v6e/v7x
        ),
    )(xp, wp, bp)
    return out[:M, :OC]


# ---------------------------------------------------------------------------
# Pallas kernel: fused heads (two bias-free matmuls over the same h)
# ---------------------------------------------------------------------------
def _heads_kernel(x1_ref, w1_ref, x2_ref, w2_ref, o1_ref, o2_ref):
    o1_ref[...] = jnp.dot(x1_ref[...], w1_ref[...],
                          preferred_element_type=jnp.float32)
    o2_ref[...] = jnp.dot(x2_ref[...], w2_ref[...],
                          preferred_element_type=jnp.float32)


def _pallas_two_head_matmul(p1, w1, p2, w2):
    M1, K1 = p1.shape
    _, O1 = w1.shape
    M2, K2 = p2.shape
    _, O2 = w2.shape
    M1p, K1p, O1p = _round_up(M1, 8), _round_up(K1, 128), _round_up(O1, 128)
    M2p, K2p, O2p = _round_up(M2, 8), _round_up(K2, 128), _round_up(O2, 128)

    p1p = jnp.pad(p1, ((0, M1p - M1), (0, K1p - K1)))
    w1p = jnp.pad(w1, ((0, K1p - K1), (0, O1p - O1)))
    p2p = jnp.pad(p2, ((0, M2p - M2), (0, K2p - K2)))
    w2p = jnp.pad(w2, ((0, K2p - K2), (0, O2p - O2)))

    out1, out2 = pl.pallas_call(
        _heads_kernel,
        out_shape=(jax.ShapeDtypeStruct((M1p, O1p), jnp.float32),
                   jax.ShapeDtypeStruct((M2p, O2p), jnp.float32)),
        grid=(1,),
        in_specs=[
            pl.BlockSpec((M1p, K1p), lambda i: (0, 0)),
            pl.BlockSpec((K1p, O1p), lambda i: (0, 0)),
            pl.BlockSpec((M2p, K2p), lambda i: (0, 0)),
            pl.BlockSpec((K2p, O2p), lambda i: (0, 0)),
        ],
        out_specs=(pl.BlockSpec((M1p, O1p), lambda i: (0, 0)),
                   pl.BlockSpec((M2p, O2p), lambda i: (0, 0))),
        compiler_params=pltpu.CompilerParams(
            dimension_semantics=("arbitrary",),
            vmem_limit_bytes=32 * 1024 * 1024,
        ),
    )(p1p, w1p, p2p, w2p)
    return out1[:M1, :O1], out2[:M2, :O2]


# ---------------------------------------------------------------------------
# im2col + weight layout glue (plain JAX, NHWC)
# ---------------------------------------------------------------------------
def _im2col_nhwc(x, KH, KW, stride, pad):
    N, H, W, C = x.shape
    xp = jnp.pad(x, ((0, 0), (pad, pad), (pad, pad), (0, 0)))
    OH = (H + 2 * pad - KH) // stride + 1
    OW = (W + 2 * pad - KW) // stride + 1
    cols = []
    for di in range(KH):
        for dj in range(KW):
            cols.append(
                xp[:,
                   di:di + (OH - 1) * stride + 1:stride,
                   dj:dj + (OW - 1) * stride + 1:stride,
                   :])
    # (N, OH, OW, KH*KW, C) -> (N*OH*OW, KH*KW*C), row index order (kh, kw, c)
    patches = jnp.stack(cols, axis=3).reshape(N * OH * OW, KH * KW * C)
    return patches, OH, OW


def _w_to_mat(w_oihw):
    # (OC, IC, KH, KW) -> (KH, KW, IC, OC) -> (KH*KW*IC, OC)
    OC, IC, KH, KW = w_oihw.shape
    return jnp.transpose(w_oihw, (2, 3, 1, 0)).reshape(KH * KW * IC, OC)


def conv2d_lrelu_nhwc(x, w_oihw, b, *, stride, pad):
    N, H, W, C = x.shape
    OC, IC, KH, KW = w_oihw.shape
    assert IC == C
    patches, OH, OW = _im2col_nhwc(x, KH, KW, stride, pad)
    out = _pallas_matmul_bias_act(patches, _w_to_mat(w_oihw), b,
                                  apply_lrelu=True)
    return out.reshape(N, OH, OW, OC)


# ---------------------------------------------------------------------------
# Discriminator
# ---------------------------------------------------------------------------
def init_discriminator_params(key, image_size=32, conv_dim=8, c_dim=5,
                              repeat_num=3):
    params = {"main": []}
    keys = jax.random.split(key, repeat_num + 2)

    def winit(k, shape):
        fan_in = shape[1] * shape[2] * shape[3]
        return (jax.random.normal(k, shape, jnp.float32)
                / np.sqrt(fan_in)).astype(jnp.float32)

    curr = conv_dim
    params["main"].append(
        (winit(keys[0], (conv_dim, 3, 4, 4)),
         jnp.zeros((conv_dim,), jnp.float32)))
    for i in range(1, repeat_num):
        params["main"].append(
            (winit(keys[i], (curr * 2, curr, 4, 4)),
             jnp.zeros((curr * 2,), jnp.float32)))
        curr *= 2

    ksize = int(image_size / np.power(2, repeat_num))
    params["conv1_w"] = winit(keys[repeat_num], (1, curr, 3, 3))
    params["conv2_w"] = winit(keys[repeat_num + 1], (c_dim, curr, ksize, ksize))
    return params


def discriminator_forward(params, x_nchw):
    # Single NCHW -> NHWC transpose at entry; NHWC end-to-end afterwards.
    h = jnp.transpose(x_nchw, (0, 2, 3, 1)).astype(jnp.float32)
    for (w, b) in params["main"]:
        h = conv2d_lrelu_nhwc(h, w, b, stride=2, pad=1)

    N = h.shape[0]
    w1 = params["conv1_w"]   # (1,      C, 3,  3)   src head
    w2 = params["conv2_w"]   # (c_dim,  C, ks, ks)  cls head
    p1, OH1, OW1 = _im2col_nhwc(h, w1.shape[2], w1.shape[3], 1, 1)
    p2, OH2, OW2 = _im2col_nhwc(h, w2.shape[2], w2.shape[3], 1, 0)
    o1, o2 = _pallas_two_head_matmul(p1, _w_to_mat(w1), p2, _w_to_mat(w2))

    out_src = o1.reshape(N, OH1, OW1, 1)
    out_src = jnp.transpose(out_src, (0, 3, 1, 2))     # single exit transpose
    out_cls = o2.reshape(N, -1)                        # OH2 = OW2 = 1
    return out_src, out_cls


# ---------------------------------------------------------------------------
# Pure-JAX reference (lax.conv, same default MXU precision) for correctness
# ---------------------------------------------------------------------------
def _ref_conv(x_nchw, w, b, stride, pad):
    out = jax.lax.conv_general_dilated(
        x_nchw, w, (stride, stride), [(pad, pad), (pad, pad)],
        dimension_numbers=("NCHW", "OIHW", "NCHW"))
    if b is not None:
        out = out + b.reshape(1, -1, 1, 1)
    return out


def discriminator_reference(params, x_nchw):
    h = x_nchw.astype(jnp.float32)
    for (w, b) in params["main"]:
        h = _ref_conv(h, w, b, 2, 1)
        h = jnp.where(h >= 0, h, 0.01 * h)
    out_src = _ref_conv(h, params["conv1_w"], None, 1, 1)
    out_cls = _ref_conv(h, params["conv2_w"], None, 1, 0)
    return out_src, out_cls.reshape(out_cls.shape[0], out_cls.shape[1])


if __name__ == "__main__":
    image_size, conv_dim, c_dim, repeat_num = 32, 8, 5, 3
    key = jax.random.PRNGKey(0)
    k_params, k_x = jax.random.split(key)

    params = init_discriminator_params(
        k_params, image_size=image_size, conv_dim=conv_dim,
        c_dim=c_dim, repeat_num=repeat_num)

    x = jax.random.normal(k_x, (2, 3, image_size, image_size), jnp.float32)

    out_src, out_cls = jax.jit(discriminator_forward)(params, x)
    jax.block_until_ready((out_src, out_cls))

    # Shape checks vs PyTorch semantics
    assert out_src.shape == (2, 1, image_size // 2 ** repeat_num,
                             image_size // 2 ** repeat_num)
    assert out_cls.shape == (2, c_dim)

    # Numerical check vs plain-JAX conv reference.  Both paths use default
    # (bf16-pass) MXU precision with f32 accumulation; tolerance covers the
    # residual accumulation-order / rounding differences while still catching
    # any real layout/semantics bug (which would be O(1)).
    ref_src, ref_cls = discriminator_reference(params, x)
    np.testing.assert_allclose(np.asarray(out_src), np.asarray(ref_src),
                               rtol=2e-2, atol=2e-2)
    np.testing.assert_allclose(np.asarray(out_cls), np.asarray(ref_cls),
                               rtol=2e-2, atol=2e-2)

    print("KERNEL_OK")
</pallas_src>

<mosaic_0001>
module attributes {stable_mosaic.version = 11 : i64} {
  func.func @_mm_bias_act_kernel(%arg0: i32, %arg1: memref<256x128xf32, #tpu.memory_space<vmem>>, %arg2: memref<128x128xf32, #tpu.memory_space<vmem>>, %arg3: memref<1x128xf32, #tpu.memory_space<vmem>>, %arg4: memref<256x128xf32, #tpu.memory_space<vmem>>) attributes {dimension_semantics = [#tpu.dimension_semantics<parallel>], iteration_bounds = array<i64: 2>, scalar_prefetch = 0 : i64, scratch_operands = 0 : i64, tpu.core_type = #tpu.core_type<tc>, window_params = [{transform_indices = @transform_0, window_bounds = array<i64: 256, 128>}, {pipeline_mode = #tpu.pipeline_mode<synchronous>, transform_indices = @transform_1, window_bounds = array<i64: 128, 128>}, {pipeline_mode = #tpu.pipeline_mode<synchronous>, transform_indices = @transform_2, window_bounds = array<i64: 1, 128>}, {transform_indices = @transform_3, window_bounds = array<i64: 256, 128>}]} {
    %c0 = arith.constant 0 : index
    %c0_0 = arith.constant 0 : index
    %0 = vector.load %arg1[%c0, %c0_0] : memref<256x128xf32, #tpu.memory_space<vmem>>, vector<256x128xf32>
    %c0_1 = arith.constant 0 : index
    %c0_2 = arith.constant 0 : index
    %1 = vector.load %arg2[%c0_1, %c0_2] : memref<128x128xf32, #tpu.memory_space<vmem>>, vector<128x128xf32>
    %cst = arith.constant dense<0.000000e+00> : vector<256x128xf32>
    %2 = tpu.matmul %0, %1, %cst {dimension_numbers = #tpu.dot_dimension_numbers<[1], [0], [0], [1], [0, 0, 1, 1], [], []>} : vector<256x128xf32>, vector<128x128xf32>, vector<256x128xf32> -> vector<256x128xf32>
    %c0_3 = arith.constant 0 : index
    %c0_4 = arith.constant 0 : index
    %3 = vector.load %arg3[%c0_3, %c0_4] : memref<1x128xf32, #tpu.memory_space<vmem>>, vector<1x128xf32>
    %4 = vector.broadcast %3 : vector<1x128xf32> to vector<256x128xf32>
    %5 = arith.addf %2, %4 : vector<256x128xf32>
    %cst_5 = arith.constant 0.000000e+00 : f32
    %6 = vector.broadcast %cst_5 : f32 to vector<256x128xf32>
    %7 = arith.cmpf oge, %5, %6 : vector<256x128xf32>
    %cst_6 = arith.constant 0.00999999977 : f32
    %8 = vector.broadcast %cst_6 : f32 to vector<256x128xf32>
    %9 = arith.mulf %8, %5 : vector<256x128xf32>
    %10 = arith.select %7, %5, %9 : vector<256x128xi1>, vector<256x128xf32>
    %c0_7 = arith.constant 0 : index
    %c0_8 = arith.constant 0 : index
    %11 = vector.load %arg4[%c0_7, %c0_8] : memref<256x128xf32, #tpu.memory_space<vmem>>, vector<256x128xf32>
    tpu.vector_store %arg4[%c0_7, %c0_8], %10 {strides = array<i32>} : memref<256x128xf32, #tpu.memory_space<vmem>>, vector<256x128xf32>,
    return
  }
  func.func @transform_0(%arg0: i32) -> (i32, i32) {
    %c0_i32 = arith.constant 0 : i32
    %c0_i32_0 = arith.constant 0 : i32
    return %arg0, %c0_i32 : i32, i32
  }
  func.func @transform_1(%arg0: i32) -> (i32, i32) {
    %c0_i32 = arith.constant 0 : i32
    %c0_i32_0 = arith.constant 0 : i32
    %c0_i32_1 = arith.constant 0 : i32
    return %c0_i32, %c0_i32_0 : i32, i32
  }
  func.func @transform_2(%arg0: i32) -> (i32, i32) {
    %c0_i32 = arith.constant 0 : i32
    %c0_i32_0 = arith.constant 0 : i32
    %c0_i32_1 = arith.constant 0 : i32
    return %c0_i32, %c0_i32_0 : i32, i32
  }
  func.func @transform_3(%arg0: i32) -> (i32, i32) {
    %c0_i32 = arith.constant 0 : i32
    %c0_i32_0 = arith.constant 0 : i32
    return %arg0, %c0_i32 : i32, i32
  }
}

module attributes {stable_mosaic.version = 11 : i64} {
  func.func @_mm_bias_act_kernel(%arg0: i32, %arg1: memref<128x128xf32, #tpu.memory_space<vmem>>, %arg2: memref<128x128xf32, #tpu.memory_space<vmem>>, %arg3: memref<1x128xf32, #tpu.memory_space<vmem>>, %arg4: memref<128x128xf32, #tpu.memory_space<vmem>>) attributes {dimension_semantics = [#tpu.dimension_semantics<parallel>], iteration_bounds = array<i64: 1>, scalar_prefetch = 0 : i64, scratch_operands = 0 : i64, tpu.core_type = #tpu.core_type<tc>, window_params = [{transform_indices = @transform_0, window_bounds = array<i64: 128, 128>}, {pipeline_mode = #tpu.pipeline_mode<synchronous>, transform_indices = @transform_1, window_bounds = array<i64: 128, 128>}, {pipeline_mode = #tpu.pipeline_mode<synchronous>, transform_indices = @transform_2, window_bounds = array<i64: 1, 128>}, {transform_indices = @transform_3, window_bounds = array<i64: 128, 128>}]} {
    %c0 = arith.constant 0 : index
    %c0_0 = arith.constant 0 : index
    %0 = vector.load %arg1[%c0, %c0_0] : memref<128x128xf32, #tpu.memory_space<vmem>>, vector<128x128xf32>
    %c0_1 = arith.constant 0 : index
    %c0_2 = arith.constant 0 : index
    %1 = vector.load %arg2[%c0_1, %c0_2] : memref<128x128xf32, #tpu.memory_space<vmem>>, vector<128x128xf32>
    %cst = arith.constant dense<0.000000e+00> : vector<128x128xf32>
    %2 = tpu.matmul %0, %1, %cst {dimension_numbers = #tpu.dot_dimension_numbers<[1], [0], [0], [1], [0, 0, 1, 1], [], []>} : vector<128x128xf32>, vector<128x128xf32>, vector<128x128xf32> -> vector<128x128xf32>
    %c0_3 = arith.constant 0 : index
    %c0_4 = arith.constant 0 : index
    %3 = vector.load %arg3[%c0_3, %c0_4] : memref<1x128xf32, #tpu.memory_space<vmem>>, vector<1x128xf32>
    %4 = vector.broadcast %3 : vector<1x128xf32> to vector<128x128xf32>
    %5 = arith.addf %2, %4 : vector<128x128xf32>
    %cst_5 = arith.constant 0.000000e+00 : f32
    %6 = vector.broadcast %cst_5 : f32 to vector<128x128xf32>
    %7 = arith.cmpf oge, %5, %6 : vector<128x128xf32>
    %cst_6 = arith.constant 0.00999999977 : f32
    %8 = vector.broadcast %cst_6 : f32 to vector<128x128xf32>
    %9 = arith.mulf %8, %5 : vector<128x128xf32>
    %10 = arith.select %7, %5, %9 : vector<128x128xi1>, vector<128x128xf32>
    %c0_7 = arith.constant 0 : index
    %c0_8 = arith.constant 0 : index
    %11 = vector.load %arg4[%c0_7, %c0_8] : memref<128x128xf32, #tpu.memory_space<vmem>>, vector<128x128xf32>
    tpu.vector_store %arg4[%c0_7, %c0_8], %10 {strides = array<i32>} : memref<128x128xf32, #tpu.memory_space<vmem>>, vector<128x128xf32>,
    return
  }
  func.func @transform_0(%arg0: i32) -> (i32, i32) {
    %c0_i32 = arith.constant 0 : i32
    %c0_i32_0 = arith.constant 0 : i32
    return %arg0, %c0_i32 : i32, i32
  }
  func.func @transform_1(%arg0: i32) -> (i32, i32) {
    %c0_i32 = arith.constant 0 : i32
    %c0_i32_0 = arith.constant 0 : i32
    %c0_i32_1 = arith.constant 0 : i32
    return %c0_i32, %c0_i32_0 : i32, i32
  }
  func.func @transform_2(%arg0: i32) -> (i32, i32) {
    %c0_i32 = arith.constant 0 : i32
    %c0_i32_0 = arith.constant 0 : i32
    %c0_i32_1 = arith.constant 0 : i32
    return %c0_i32, %c0_i32_0 : i32, i32
  }
  func.func @transform_3(%arg0: i32) -> (i32, i32) {
    %c0_i32 = arith.constant 0 : i32
    %c0_i32_0 = arith.constant 0 : i32
    return %arg0, %c0_i32 : i32, i32
  }
}

module attributes {stable_mosaic.version = 11 : i64} {
  func.func @_mm_bias_act_kernel(%arg0: i32, %arg1: memref<32x256xf32, #tpu.memory_space<vmem>>, %arg2: memref<256x128xf32, #tpu.memory_space<vmem>>, %arg3: memref<1x128xf32, #tpu.memory_space<vmem>>, %arg4: memref<32x128xf32, #tpu.memory_space<vmem>>) attributes {dimension_semantics = [#tpu.dimension_semantics<parallel>], iteration_bounds = array<i64: 1>, scalar_prefetch = 0 : i64, scratch_operands = 0 : i64, tpu.core_type = #tpu.core_type<tc>, window_params = [{transform_indices = @transform_0, window_bounds = array<i64: 32, 256>}, {pipeline_mode = #tpu.pipeline_mode<synchronous>, transform_indices = @transform_1, window_bounds = array<i64: 256, 128>}, {pipeline_mode = #tpu.pipeline_mode<synchronous>, transform_indices = @transform_2, window_bounds = array<i64: 1, 128>}, {transform_indices = @transform_3, window_bounds = array<i64: 32, 128>}]} {
    %c0 = arith.constant 0 : index
    %c0_0 = arith.constant 0 : index
    %0 = vector.load %arg1[%c0, %c0_0] : memref<32x256xf32, #tpu.memory_space<vmem>>, vector<32x256xf32>
    %c0_1 = arith.constant 0 : index
    %c0_2 = arith.constant 0 : index
    %1 = vector.load %arg2[%c0_1, %c0_2] : memref<256x128xf32, #tpu.memory_space<vmem>>, vector<256x128xf32>
    %cst = arith.constant dense<0.000000e+00> : vector<32x128xf32>
    %2 = tpu.matmul %0, %1, %cst {dimension_numbers = #tpu.dot_dimension_numbers<[1], [0], [0], [1], [0, 0, 1, 1], [], []>} : vector<32x256xf32>, vector<256x128xf32>, vector<32x128xf32> -> vector<32x128xf32>
    %c0_3 = arith.constant 0 : index
    %c0_4 = arith.constant 0 : index
    %3 = vector.load %arg3[%c0_3, %c0_4] : memref<1x128xf32, #tpu.memory_space<vmem>>, vector<1x128xf32>
    %4 = vector.broadcast %3 : vector<1x128xf32> to vector<32x128xf32>
    %5 = arith.addf %2, %4 : vector<32x128xf32>
    %cst_5 = arith.constant 0.000000e+00 : f32
    %6 = vector.broadcast %cst_5 : f32 to vector<32x128xf32>
    %7 = arith.cmpf oge, %5, %6 : vector<32x128xf32>
    %cst_6 = arith.constant 0.00999999977 : f32
    %8 = vector.broadcast %cst_6 : f32 to vector<32x128xf32>
    %9 = arith.mulf %8, %5 : vector<32x128xf32>
    %10 = arith.select %7, %5, %9 : vector<32x128xi1>, vector<32x128xf32>
    %c0_7 = arith.constant 0 : index
    %c0_8 = arith.constant 0 : index
    %11 = vector.load %arg4[%c0_7, %c0_8] : memref<32x128xf32, #tpu.memory_space<vmem>>, vector<32x128xf32>
    tpu.vector_store %arg4[%c0_7, %c0_8], %10 {strides = array<i32>} : memref<32x128xf32, #tpu.memory_space<vmem>>, vector<32x128xf32>,
    return
  }
  func.func @transform_0(%arg0: i32) -> (i32, i32) {
    %c0_i32 = arith.constant 0 : i32
    %c0_i32_0 = arith.constant 0 : i32
    return %arg0, %c0_i32 : i32, i32
  }
  func.func @transform_1(%arg0: i32) -> (i32, i32) {
    %c0_i32 = arith.constant 0 : i32
    %c0_i32_0 = arith.constant 0 : i32
    %c0_i32_1 = arith.constant 0 : i32
    return %c0_i32, %c0_i32_0 : i32, i32
  }
  func.func @transform_2(%arg0: i32) -> (i32, i32) {
    %c0_i32 = arith.constant 0 : i32
    %c0_i32_0 = arith.constant 0 : i32
    %c0_i32_1 = arith.constant 0 : i32
    return %c0_i32, %c0_i32_0 : i32, i32
  }
  func.func @transform_3(%arg0: i32) -> (i32, i32) {
    %c0_i32 = arith.constant 0 : i32
    %c0_i32_0 = arith.constant 0 : i32
    return %arg0, %c0_i32 : i32, i32
  }
}

module attributes {stable_mosaic.version = 11 : i64} {
  func.func @_heads_kernel(%arg0: i32, %arg1: memref<32x384xf32, #tpu.memory_space<vmem>>, %arg2: memref<384x128xf32, #tpu.memory_space<vmem>>, %arg3: memref<8x512xf32, #tpu.memory_space<vmem>>, %arg4: memref<512x128xf32, #tpu.memory_space<vmem>>, %arg5: memref<32x128xf32, #tpu.memory_space<vmem>>, %arg6: memref<8x128xf32, #tpu.memory_space<vmem>>) attributes {dimension_semantics = [#tpu.dimension_semantics<arbitrary>], iteration_bounds = array<i64: 1>, scalar_prefetch = 0 : i64, scratch_operands = 0 : i64, tpu.core_type = #tpu.core_type<tc>, window_params = [{pipeline_mode = #tpu.pipeline_mode<synchronous>, transform_indices = @transform_0, window_bounds = array<i64: 32, 384>}, {pipeline_mode = #tpu.pipeline_mode<synchronous>, transform_indices = @transform_1, window_bounds = array<i64: 384, 128>}, {pipeline_mode = #tpu.pipeline_mode<synchronous>, transform_indices = @transform_2, window_bounds = array<i64: 8, 512>}, {pipeline_mode = #tpu.pipeline_mode<synchronous>, transform_indices = @transform_3, window_bounds = array<i64: 512, 128>}, {pipeline_mode = #tpu.pipeline_mode<synchronous>, transform_indices = @transform_4, window_bounds = array<i64: 32, 128>}, {pipeline_mode = #tpu.pipeline_mode<synchronous>, transform_indices = @transform_5, window_bounds = array<i64: 8, 128>}]} {
    %c0 = arith.constant 0 : index
    %c0_0 = arith.constant 0 : index
    %0 = vector.load %arg1[%c0, %c0_0] : memref<32x384xf32, #tpu.memory_space<vmem>>, vector<32x384xf32>
    %c0_1 = arith.constant 0 : index
    %c0_2 = arith.constant 0 : index
    %1 = vector.load %arg2[%c0_1, %c0_2] : memref<384x128xf32, #tpu.memory_space<vmem>>, vector<384x128xf32>
    %cst = arith.constant dense<0.000000e+00> : vector<32x128xf32>
    %2 = tpu.matmul %0, %1, %cst {dimension_numbers = #tpu.dot_dimension_numbers<[1], [0], [0], [1], [0, 0, 1, 1], [], []>} : vector<32x384xf32>, vector<384x128xf32>, vector<32x128xf32> -> vector<32x128xf32>
    %c0_3 = arith.constant 0 : index
    %c0_4 = arith.constant 0 : index
    %3 = vector.load %arg5[%c0_3, %c0_4] : memref<32x128xf32, #tpu.memory_space<vmem>>, vector<32x128xf32>
    tpu.vector_store %arg5[%c0_3, %c0_4], %2 {strides = array<i32>} : memref<32x128xf32, #tpu.memory_space<vmem>>, vector<32x128xf32>,
    %c0_5 = arith.constant 0 : index
    %c0_6 = arith.constant 0 : index
    %4 = vector.load %arg3[%c0_5, %c0_6] : memref<8x512xf32, #tpu.memory_space<vmem>>, vector<8x512xf32>
    %c0_7 = arith.constant 0 : index
    %c0_8 = arith.constant 0 : index
    %5 = vector.load %arg4[%c0_7, %c0_8] : memref<512x128xf32, #tpu.memory_space<vmem>>, vector<512x128xf32>
    %cst_9 = arith.constant dense<0.000000e+00> : vector<8x128xf32>
    %6 = tpu.matmul %4, %5, %cst_9 {dimension_numbers = #tpu.dot_dimension_numbers<[1], [0], [0], [1], [0, 0, 1, 1], [], []>} : vector<8x512xf32>, vector<512x128xf32>, vector<8x128xf32> -> vector<8x128xf32>
    %c0_10 = arith.constant 0 : index
    %c0_11 = arith.constant 0 : index
    %7 = vector.load %arg6[%c0_10, %c0_11] : memref<8x128xf32, #tpu.memory_space<vmem>>, vector<8x128xf32>
    tpu.vector_store %arg6[%c0_10, %c0_11], %6 {strides = array<i32>} : memref<8x128xf32, #tpu.memory_space<vmem>>, vector<8x128xf32>,
    return
  }
  func.func @transform_0(%arg0: i32) -> (i32, i32) {
    %c0_i32 = arith.constant 0 : i32
    %c0_i32_0 = arith.constant 0 : i32
    %c0_i32_1 = arith.constant 0 : i32
    return %c0_i32, %c0_i32_0 : i32, i32
  }
  func.func @transform_1(%arg0: i32) -> (i32, i32) {
    %c0_i32 = arith.constant 0 : i32
    %c0_i32_0 = arith.constant 0 : i32
    %c0_i32_1 = arith.constant 0 : i32
    return %c0_i32, %c0_i32_0 : i32, i32
  }
  func.func @transform_2(%arg0: i32) -> (i32, i32) {
    %c0_i32 = arith.constant 0 : i32
    %c0_i32_0 = arith.constant 0 : i32
    %c0_i32_1 = arith.constant 0 : i32
    return %c0_i32, %c0_i32_0 : i32, i32
  }
  func.func @transform_3(%arg0: i32) -> (i32, i32) {
    %c0_i32 = arith.constant 0 : i32
    %c0_i32_0 = arith.constant 0 : i32
    %c0_i32_1 = arith.constant 0 : i32
    return %c0_i32, %c0_i32_0 : i32, i32
  }
  func.func @transform_4(%arg0: i32) -> (i32, i32) {
    %c0_i32 = arith.constant 0 : i32
    %c0_i32_0 = arith.constant 0 : i32
    %c0_i32_1 = arith.constant 0 : i32
    return %c0_i32, %c0_i32_0 : i32, i32
  }
  func.func @transform_5(%arg0: i32) -> (i32, i32) {
    %c0_i32 = arith.constant 0 : i32
    %c0_i32_0 = arith.constant 0 : i32
    %c0_i32_1 = arith.constant 0 : i32
    return %c0_i32, %c0_i32_0 : i32, i32
  }
}

</mosaic_0001>

<bundles_post_ra>
// kernel: discriminator_forward.4
= control target key start
LH: loop header
LB: loop body
LE: loop exit
PB: predicated region body
PF: predicated region fallthrough
CT: control target
= control target key end

     0   :  { %s619_s12 = smov 0   ;;  %s798_s0 = inlined_call_operand.vmem [shape: f32[512,128], index: 0, kind: input, shape index: {}]   ;;  %s799_s1 = inlined_call_operand.vmem [shape: f32[128,128], index: 1, kind: input, shape index: {}]   ;;  %s800_s2 = inlined_call_operand.vmem [shape: f32[1,128], index: 2, kind: input, shape index: {}]   ;;  %s801_s3 = inlined_call_operand.vmem [shape: f32[512,128], index: 3, kind: output, shape index: {}]  }
   0x1 LB: > { %s523_s13 = sadd.s32 4294967295, %s597_s12   ;;  %p527_p0 = scmp.ge.s32.totalorder %s597_s12, 1  ;;  %s597_s12 = sphi %s619_s12, %s13_s12  }
   0x2   : > { %p138_p1 = scmp.lt.s32.totalorder %s597_s12, 3 }
   0x4   : > { %p139_p2 = pnand %p527_p0, %p138_p1 }
   0x5   : > { %s528_s30 = sshll.u32 (!%p139_p2), %s523_s13, 5 }
   0x6   : > { %142 = sbr.rel (%p139_p2) target bundleno = 238 (0xee), region = 32  ;;  %p163_p3 = scmp.lt.s32.totalorder (!%p139_p2), %s528_s30, 63 }
   0xb   : > { %v221_v0 = vld [vmem:[%s799_s1 + $0x78] sm:$0xff]  ;;  %v220_v1 = vld [vmem:[%s799_s1 + $0x70] sm:$0xff]  ;;  %v219_v2 = vld [vmem:[%s799_s1 + $0x68] sm:$0xff]  ;;  %s803_s30 = smov (!%p163_p3, %s528_s30), 63 }
   0xc   : > { %535 = vmatpush.msra.mxu2 %v221_v0  ;;  %536 = vmatpush.msra.mxu3 %v221_v0  ;;  %v218_v3 = vld [vmem:[%s799_s1 + $0x60] sm:$0xff]  ;;  %v217_v4 = vld [vmem:[%s799_s1 + $0x58] sm:$0xff]  ;;  %v216_v5 = vld [vmem:[%s799_s1 + $0x50] sm:$0xff]  ;;  %s529_s15 = sshll.u32 %s803_s30, 3 }
   0xd   : > { %226 = vmatpush.msra.mxu0 %v221_v0  ;;  %534 = vmatpush.msra.mxu1 %v221_v0  ;;  %v215_v6 = vld [vmem:[%s799_s1 + $0x48] sm:$0xff]  ;;  %v214_v7 = vld [vmem:[%s799_s1 + $0x40] sm:$0xff]  ;;  %v213_v8 = vld [vmem:[%s799_s1 + $0x38] sm:$0xff]  ;;  %s682_s22 = scalar_lea.vmem %s798_s0, %s529_s15  ;;  %s731_s29 = scalar_lea.vmem %s801_s3, %s529_s15 }
   0xe   : > { %538 = vmatpush.msra.mxu2 %v220_v1  ;;  %539 = vmatpush.msra.mxu3 %v220_v1  ;;  %v212_v9 = vld [vmem:[%s799_s1 + $0x30] sm:$0xff]  ;;  %v211_v10 = vld [vmem:[%s799_s1 + $0x28] sm:$0xff]  ;;  %v210_v11 = vld [vmem:[%s799_s1 + $0x20] sm:$0xff] }
   0xf   : > { %227 = vmatpush.msra.mxu0 %v220_v1  ;;  %537 = vmatpush.msra.mxu1 %v220_v1  ;;  %v209_v12 = vld [vmem:[%s799_s1 + $0x18] sm:$0xff]  ;;  %v208_v13 = vld [vmem:[%s799_s1 + $0x10] sm:$0xff]  ;;  %v207_v14 = vld [vmem:[%s799_s1 + $0x8] sm:$0xff] }
  0x10   : > { %541 = vmatpush.msra.mxu2 %v219_v2  ;;  %542 = vmatpush.msra.mxu3 %v219_v2  ;;  %v206_v15 = vld [vmem:[%s799_s1] sm:$0xff]  ;;  %v191_v20 = vld [vmem:[%s682_s22 + $0x88] sm:$0xff]  ;;  %v192_v24 = vld [vmem:[%s682_s22 + $0x90] sm:$0xff] }
  0x11   : > { %228 = vmatpush.msra.mxu0 %v219_v2  ;;  %540 = vmatpush.msra.mxu1 %v219_v2  ;;  %v190_v16 = vld [vmem:[%s682_s22 + $0x80] sm:$0xff]  ;;  %v199_v21 = vld [vmem:[%s682_s22 + $0xc8] sm:$0xff]  ;;  %v200_v25 = vld [vmem:[%s682_s22 + $0xd0] sm:$0xff] }
  0x12   : > { %544 = vmatpush.msra.mxu2 %v218_v3  ;;  %545 = vmatpush.msra.mxu3 %v218_v3  ;;  %v198_v17 = vld [vmem:[%s682_s22 + $0xc0] sm:$0xff]  ;;  %v175_v22 = vld [vmem:[%s682_s22 + $0x8] sm:$0xff]  ;;  %v176_v26 = vld [vmem:[%s682_s22 + $0x10] sm:$0xff] }
  0x13   : > { %229 = vmatpush.msra.mxu0 %v218_v3  ;;  %543 = vmatpush.msra.mxu1 %v218_v3  ;;  %v174_v18 = vld [vmem:[%s682_s22] sm:$0xff]  ;;  %v183_v23 = vld [vmem:[%s682_s22 + $0x48] sm:$0xff]  ;;  %v184_v27 = vld [vmem:[%s682_s22 + $0x50] sm:$0xff] }
  0x14   : > { %547 = vmatpush.msra.mxu2 %v217_v4  ;;  %548 = vmatpush.msra.mxu3 %v217_v4  ;;  %v182_v19 = vld [vmem:[%s682_s22 + $0x40] sm:$0xff]  ;;  %v193_v28 = vld [vmem:[%s682_s22 + $0x98] sm:$0xff]  ;;  %v195_v36 = vld [vmem:[%s682_s22 + $0xa8] sm:$0xff] }
  0x15   : > { %230 = vmatpush.msra.mxu0 %v217_v4  ;;  %546 = vmatpush.msra.mxu1 %v217_v4  ;;  %v201_v29 = vld [vmem:[%s682_s22 + $0xd8] sm:$0xff]  ;;  %v194_v32 = vld [vmem:[%s682_s22 + $0xa0] sm:$0xff]  ;;  %v203_v37 = vld [vmem:[%s682_s22 + $0xe8] sm:$0xff] }
  0x16   : > { %550 = vmatpush.msra.mxu2 %v216_v5  ;;  %551 = vmatpush.msra.mxu3 %v216_v5  ;;  %v177_v30 = vld [vmem:[%s682_s22 + $0x18] sm:$0xff]  ;;  %v202_v33 = vld [vmem:[%s682_s22 + $0xe0] sm:$0xff]  ;;  %v179_v38 = vld [vmem:[%s682_s22 + $0x28] sm:$0xff] }
  0x17   : > { %231 = vmatpush.msra.mxu0 %v216_v5  ;;  %549 = vmatpush.msra.mxu1 %v216_v5  ;;  %v185_v31 = vld [vmem:[%s682_s22 + $0x58] sm:$0xff]  ;;  %v178_v34 = vld [vmem:[%s682_s22 + $0x20] sm:$0xff]  ;;  %v187_v39 = vld [vmem:[%s682_s22 + $0x68] sm:$0xff] }
  0x18   : > { %553 = vmatpush.msra.mxu2 %v215_v6  ;;  %554 = vmatpush.msra.mxu3 %v215_v6  ;;  %v186_v35 = vld [vmem:[%s682_s22 + $0x60] sm:$0xff]  ;;  %v196_v40 = vld [vmem:[%s682_s22 + $0xb0] sm:$0xff]  ;;  %v197_v44 = vld [vmem:[%s682_s22 + $0xb8] sm:$0xff] }
  0x19   : > { %232 = vmatpush.msra.mxu0 %v215_v6  ;;  %552 = vmatpush.msra.mxu1 %v215_v6  ;;  %v204_v41 = vld [vmem:[%s682_s22 + $0xf0] sm:$0xff]  ;;  %v205_v45 = vld [vmem:[%s682_s22 + $0xf8] sm:$0xff]  ;;  %v722_v48 = vld [vmem:[%s800_s2] ss:$0 sm:$0xff] }
  0x1a   : > { %556 = vmatpush.msra.mxu2 %v214_v7  ;;  %557 = vmatpush.msra.mxu3 %v214_v7  ;;  %v180_v42 = vld [vmem:[%s682_s22 + $0x30] sm:$0xff]  ;;  %v181_v46 = vld [vmem:[%s682_s22 + $0x38] sm:$0xff] }
  0x1b   : > { %233 = vmatpush.msra.mxu0 %v214_v7  ;;  %555 = vmatpush.msra.mxu1 %v214_v7  ;;  %v188_v43 = vld [vmem:[%s682_s22 + $0x70] sm:$0xff]  ;;  %v189_v47 = vld [vmem:[%s682_s22 + $0x78] sm:$0xff] }
  0x1c   : > { %559 = vmatpush.msra.mxu2 %v213_v8  ;;  %560 = vmatpush.msra.mxu3 %v213_v8 }
  0x1d   : > { %234 = vmatpush.msra.mxu0 %v213_v8  ;;  %558 = vmatpush.msra.mxu1 %v213_v8 }
  0x1e   : > { %562 = vmatpush.msra.mxu2 %v212_v9  ;;  %563 = vmatpush.msra.mxu3 %v212_v9 }
  0x1f   : > { %235 = vmatpush.msra.mxu0 %v212_v9  ;;  %561 = vmatpush.msra.mxu1 %v212_v9 }
  0x20   : > { %565 = vmatpush.msra.mxu2 %v211_v10  ;;  %566 = vmatpush.msra.mxu3 %v211_v10 }
  0x21   : > { %236 = vmatpush.msra.mxu0 %v211_v10  ;;  %564 = vmatpush.msra.mxu1 %v211_v10 }
  0x22   : > { %568 = vmatpush.msra.mxu2 %v210_v11  ;;  %569 = vmatpush.msra.mxu3 %v210_v11 }
  0x23   : > { %237 = vmatpush.msra.mxu0 %v210_v11  ;;  %567 = vmatpush.msra.mxu1 %v210_v11 }
  0x24   : > { %571 = vmatpush.msra.mxu2 %v209_v12  ;;  %572 = vmatpush.msra.mxu3 %v209_v12 }
  0x25   : > { %238 = vmatpush.msra.mxu0 %v209_v12  ;;  %570 = vmatpush.msra.mxu1 %v209_v12 }
  0x26   : > { %574 = vmatpush.msra.mxu2 %v208_v13  ;;  %575 = vmatpush.msra.mxu3 %v208_v13 }
  0x27   : > { %239 = vmatpush.msra.mxu0 %v208_v13  ;;  %573 = vmatpush.msra.mxu1 %v208_v13 }
  0x28   : > { %577 = vmatpush.msra.mxu2 %v207_v14  ;;  %578 = vmatpush.msra.mxu3 %v207_v14 }
  0x29   : > { %240 = vmatpush.msra.mxu0 %v207_v14  ;;  %576 = vmatpush.msra.mxu1 %v207_v14 }
  0x2a   : > { %580 = vmatpush.msra.mxu2 %v206_v15  ;;  %581 = vmatpush.msra.mxu3 %v206_v15 }
  0x2b   : > { %290 = vmatmul.f32.vlgmr.msra.gmra.mxu2 %v190_v16  ;;  %314 = vmatmul.f32.vlgmr.msra.gmra.mxu3 %v198_v17 }
  0x2c   : > { %241 = vmatpush.msra.mxu0 %v206_v15  ;;  %579 = vmatpush.msra.mxu1 %v206_v15 }
  0x2d   : > { %242 = vmatmul.f32.vlgmr.msra.gmra.mxu0 %v174_v18  ;;  %266 = vmatmul.f32.vlgmr.msra.gmra.mxu1 %v182_v19 }
  0x33   : > { %293 = vmatmul.f32.gmra.mxu2 %v191_v20  ;;  %317 = vmatmul.f32.gmra.mxu3 %v199_v21 }
  0x35   : > { %245 = vmatmul.f32.gmra.mxu0 %v175_v22  ;;  %269 = vmatmul.f32.gmra.mxu1 %v183_v23 }
  0x3b   : > { %296 = vmatmul.f32.gmra.mxu2 %v192_v24  ;;  %320 = vmatmul.f32.gmra.mxu3 %v200_v25 }
  0x3d   : > { %248 = vmatmul.f32.gmra.mxu0 %v176_v26  ;;  %272 = vmatmul.f32.gmra.mxu1 %v184_v27 }
  0x43   : > { %299 = vmatmul.f32.gmra.mxu2 %v193_v28  ;;  %323 = vmatmul.f32.gmra.mxu3 %v201_v29 }
  0x45   : > { %251 = vmatmul.f32.gmra.mxu0 %v177_v30  ;;  %275 = vmatmul.f32.gmra.mxu1 %v185_v31 }
  0x4b   : > { %302 = vmatmul.f32.gmra.mxu2 %v194_v32  ;;  %326 = vmatmul.f32.gmra.mxu3 %v202_v33 }
  0x4d   : > { %254 = vmatmul.f32.gmra.mxu0 %v178_v34  ;;  %278 = vmatmul.f32.gmra.mxu1 %v186_v35 }
  0x53   : > { %305 = vmatmul.f32.gmra.mxu2 %v195_v36  ;;  %329 = vmatmul.f32.gmra.mxu3 %v203_v37 }
  0x55   : > { %257 = vmatmul.f32.gmra.mxu0 %v179_v38  ;;  %281 = vmatmul.f32.gmra.mxu1 %v187_v39 }
  0x5b   : > { %308 = vmatmul.f32.gmra.mxu2 %v196_v40  ;;  %332 = vmatmul.f32.gmra.mxu3 %v204_v41 }
  0x5d   : > { %260 = vmatmul.f32.gmra.mxu0 %v180_v42  ;;  %284 = vmatmul.f32.gmra.mxu1 %v188_v43 }
  0x63   : > { %311 = vmatmul.f32.gmra.mxu2 %v197_v44  ;;  %335 = vmatmul.f32.gmra.mxu3 %v205_v45 }
  0x65   : > { %263 = vmatmul.f32.gmra.mxu0 %v181_v46  ;;  %287 = vmatmul.f32.gmra.mxu1 %v189_v47 }
  0xaa   : > { %v243_v49 = vpop.f32.mrf.mxu0  ;;  %v267_v50 = vpop.f32.mrf.mxu1 }
  0xab   : > { %v244_v51 = vadd.f32 %v722_v48, %v243_v49  ;;  %v268_v52 = vadd.f32 %v722_v48, %v267_v50 }
  0xad   : > { %vm339_vm0 = vcmp.ge.f32.partialorder %v244_v51, 0.0  ;;  %v371_v53 = vmul.f32 0.01, %v244_v51  ;;  %vm347_vm1 = vcmp.ge.f32.partialorder %v268_v52, 0.0  ;;  %v379_v54 = vmul.f32 0.01, %v268_v52 }
  0xae   : > { %v291_v55 = vpop.f32.mrf.mxu2  ;;  %v315_v56 = vpop.f32.mrf.mxu3 }
  0xaf   : > { %v403_v57 = vsel %vm339_vm0, %v244_v51, %v371_v53  ;;  %v411_v58 = vsel %vm347_vm1, %v268_v52, %v379_v54  ;;  %v292_v59 = vadd.f32 %v722_v48, %v291_v55  ;;  %v316_v60 = vadd.f32 %v722_v48, %v315_v56 }
  0xb0   : > { %435 = vst [vmem:[%s731_s29] sm:$0xff] %v403_v57 }
  0xb1   : > { %443 = vst [vmem:[%s731_s29 + $0x40] sm:$0xff] %v411_v58  ;;  %vm355_vm2 = vcmp.ge.f32.partialorder %v292_v59, 0.0  ;;  %v387_v61 = vmul.f32 0.01, %v292_v59  ;;  %vm363_vm3 = vcmp.ge.f32.partialorder %v316_v60, 0.0 }
  0xb2   : > { %v395_v62 = vmul.f32 0.01, %v316_v60  ;;  %v246_v63 = vpop.f32.mrf.mxu0  ;;  %v270_v0 = vpop.f32.mrf.mxu1 }
  0xb3   : > { %v419_v1 = vsel %vm355_vm2, %v292_v59, %v387_v61  ;;  %v247_v2 = vadd.f32 %v722_v48, %v246_v63  ;;  %v271_v3 = vadd.f32 %v722_v48, %v270_v0 }
  0xb4   : > { %451 = vst [vmem:[%s731_s29 + $0x80] sm:$0xff] %v419_v1  ;;  %v427_v4 = vsel %vm363_vm3, %v316_v60, %v395_v62 }
  0xb5   : > { %459 = vst [vmem:[%s731_s29 + $0xc0] sm:$0xff] %v427_v4  ;;  %vm340_vm4 = vcmp.ge.f32.partialorder %v247_v2, 0.0  ;;  %v372_v5 = vmul.f32 0.01, %v247_v2  ;;  %vm348_vm5 = vcmp.ge.f32.partialorder %v271_v3, 0.0 }
  0xb6   : > { %v380_v6 = vmul.f32 0.01, %v271_v3  ;;  %v294_v7 = vpop.f32.mrf.mxu2  ;;  %v318_v8 = vpop.f32.mrf.mxu3 }
  0xb7   : > { %v404_v9 = vsel %vm340_vm4, %v247_v2, %v372_v5  ;;  %v295_v10 = vadd.f32 %v722_v48, %v294_v7  ;;  %v319_v11 = vadd.f32 %v722_v48, %v318_v8 }
  0xb8   : > { %436 = vst [vmem:[%s731_s29 + $0x8] sm:$0xff] %v404_v9  ;;  %v412_v12 = vsel %vm348_vm5, %v271_v3, %v380_v6 }
  0xb9   : > { %444 = vst [vmem:[%s731_s29 + $0x48] sm:$0xff] %v412_v12  ;;  %vm356_vm6 = vcmp.ge.f32.partialorder %v295_v10, 0.0  ;;  %v388_v13 = vmul.f32 0.01, %v295_v10  ;;  %vm364_vm7 = vcmp.ge.f32.partialorder %v319_v11, 0.0 }
  0xba   : > { %v396_v14 = vmul.f32 0.01, %v319_v11  ;;  %v249_v15 = vpop.f32.mrf.mxu0  ;;  %v273_v16 = vpop.f32.mrf.mxu1 }
  0xbb   : > { %v420_v17 = vsel %vm356_vm6, %v295_v10, %v388_v13  ;;  %v250_v18 = vadd.f32 %v722_v48, %v249_v15  ;;  %v274_v19 = vadd.f32 %v722_v48, %v273_v16 }
  0xbc   : > { %452 = vst [vmem:[%s731_s29 + $0x88] sm:$0xff] %v420_v17  ;;  %v428_v20 = vsel %vm364_vm7, %v319_v11, %v396_v14 }
  0xbd   : > { %460 = vst [vmem:[%s731_s29 + $0xc8] sm:$0xff] %v428_v20  ;;  %vm341_vm8 = vcmp.ge.f32.partialorder %v250_v18, 0.0  ;;  %v373_v21 = vmul.f32 0.01, %v250_v18  ;;  %vm349_vm9 = vcmp.ge.f32.partialorder %v274_v19, 0.0 }
  0xbe   : > { %v381_v22 = vmul.f32 0.01, %v274_v19  ;;  %v297_v23 = vpop.f32.mrf.mxu2  ;;  %v321_v24 = vpop.f32.mrf.mxu3 }
  0xbf   : > { %v405_v25 = vsel %vm341_vm8, %v250_v18, %v373_v21  ;;  %v298_v26 = vadd.f32 %v722_v48, %v297_v23  ;;  %v322_v27 = vadd.f32 %v722_v48, %v321_v24 }
  0xc0   : > { %437 = vst [vmem:[%s731_s29 + $0x10] sm:$0xff] %v405_v25  ;;  %v413_v28 = vsel %vm349_vm9, %v274_v19, %v381_v22 }
  0xc1   : > { %445 = vst [vmem:[%s731_s29 + $0x50] sm:$0xff] %v413_v28  ;;  %vm357_vm10 = vcmp.ge.f32.partialorder %v298_v26, 0.0  ;;  %v389_v29 = vmul.f32 0.01, %v298_v26  ;;  %vm365_vm11 = vcmp.ge.f32.partialorder %v322_v27, 0.0 }
  0xc2   : > { %v397_v30 = vmul.f32 0.01, %v322_v27  ;;  %v252_v31 = vpop.f32.mrf.mxu0  ;;  %v276_v32 = vpop.f32.mrf.mxu1 }
  0xc3   : > { %v421_v33 = vsel %vm357_vm10, %v298_v26, %v389_v29  ;;  %v253_v34 = vadd.f32 %v722_v48, %v252_v31  ;;  %v277_v35 = vadd.f32 %v722_v48, %v276_v32 }
  0xc4   : > { %453 = vst [vmem:[%s731_s29 + $0x90] sm:$0xff] %v421_v33  ;;  %v429_v36 = vsel %vm365_vm11, %v322_v27, %v397_v30 }
  0xc5   : > { %461 = vst [vmem:[%s731_s29 + $0xd0] sm:$0xff] %v429_v36  ;;  %vm342_vm12 = vcmp.ge.f32.partialorder %v253_v34, 0.0  ;;  %v374_v37 = vmul.f32 0.01, %v253_v34  ;;  %vm350_vm13 = vcmp.ge.f32.partialorder %v277_v35, 0.0 }
  0xc6   : > { %v382_v38 = vmul.f32 0.01, %v277_v35  ;;  %v300_v39 = vpop.f32.mrf.mxu2  ;;  %v324_v40 = vpop.f32.mrf.mxu3 }
  0xc7   : > { %v406_v41 = vsel %vm342_vm12, %v253_v34, %v374_v37  ;;  %v301_v42 = vadd.f32 %v722_v48, %v300_v39  ;;  %v325_v43 = vadd.f32 %v722_v48, %v324_v40 }
  0xc8   : > { %438 = vst [vmem:[%s731_s29 + $0x18] sm:$0xff] %v406_v41  ;;  %v414_v44 = vsel %vm350_vm13, %v277_v35, %v382_v38 }
  0xc9   : > { %446 = vst [vmem:[%s731_s29 + $0x58] sm:$0xff] %v414_v44  ;;  %vm358_vm14 = vcmp.ge.f32.partialorder %v301_v42, 0.0  ;;  %v390_v45 = vmul.f32 0.01, %v301_v42  ;;  %vm366_vm15 = vcmp.ge.f32.partialorder %v325_v43, 0.0 }
  0xca   : > { %v398_v46 = vmul.f32 0.01, %v325_v43  ;;  %v255_v47 = vpop.f32.mrf.mxu0  ;;  %v279_v49 = vpop.f32.mrf.mxu1 }
  0xcb   : > { %v422_v50 = vsel %vm358_vm14, %v301_v42, %v390_v45  ;;  %v256_v51 = vadd.f32 %v722_v48, %v255_v47  ;;  %v280_v52 = vadd.f32 %v722_v48, %v279_v49 }
  0xcc   : > { %454 = vst [vmem:[%s731_s29 + $0x98] sm:$0xff] %v422_v50  ;;  %v430_v53 = vsel %vm366_vm15, %v325_v43, %v398_v46 }
  0xcd   : > { %462 = vst [vmem:[%s731_s29 + $0xd8] sm:$0xff] %v430_v53  ;;  %vm343_vm0 = vcmp.ge.f32.partialorder %v256_v51, 0.0  ;;  %v375_v54 = vmul.f32 0.01, %v256_v51  ;;  %vm351_vm1 = vcmp.ge.f32.partialorder %v280_v52, 0.0 }
  0xce   : > { %v383_v55 = vmul.f32 0.01, %v280_v52  ;;  %v303_v56 = vpop.f32.mrf.mxu2  ;;  %v327_v57 = vpop.f32.mrf.mxu3 }
  0xcf   : > { %v407_v58 = vsel %vm343_vm0, %v256_v51, %v375_v54  ;;  %v304_v59 = vadd.f32 %v722_v48, %v303_v56  ;;  %v328_v60 = vadd.f32 %v722_v48, %v327_v57 }
  0xd0   : > { %439 = vst [vmem:[%s731_s29 + $0x20] sm:$0xff] %v407_v58  ;;  %v415_v61 = vsel %vm351_vm1, %v280_v52, %v383_v55 }
  0xd1   : > { %447 = vst [vmem:[%s731_s29 + $0x60] sm:$0xff] %v415_v61  ;;  %vm359_vm2 = vcmp.ge.f32.partialorder %v304_v59, 0.0  ;;  %v391_v62 = vmul.f32 0.01, %v304_v59  ;;  %vm367_vm3 = vcmp.ge.f32.partialorder %v328_v60, 0.0 }
  0xd2   : > { %v399_v63 = vmul.f32 0.01, %v328_v60  ;;  %v258_v0 = vpop.f32.mrf.mxu0  ;;  %v282_v1 = vpop.f32.mrf.mxu1 }
  0xd3   : > { %v423_v2 = vsel %vm359_vm2, %v304_v59, %v391_v62  ;;  %v259_v3 = vadd.f32 %v722_v48, %v258_v0  ;;  %v283_v4 = vadd.f32 %v722_v48, %v282_v1 }
  0xd4   : > { %455 = vst [vmem:[%s731_s29 + $0xa0] sm:$0xff] %v423_v2  ;;  %v431_v5 = vsel %vm367_vm3, %v328_v60, %v399_v63 }
  0xd5   : > { %463 = vst [vmem:[%s731_s29 + $0xe0] sm:$0xff] %v431_v5  ;;  %vm344_vm4 = vcmp.ge.f32.partialorder %v259_v3, 0.0  ;;  %v376_v6 = vmul.f32 0.01, %v259_v3  ;;  %vm352_vm5 = vcmp.ge.f32.partialorder %v283_v4, 0.0 }
  0xd6   : > { %v384_v7 = vmul.f32 0.01, %v283_v4  ;;  %v306_v8 = vpop.f32.mrf.mxu2  ;;  %v330_v9 = vpop.f32.mrf.mxu3 }
  0xd7   : > { %v408_v10 = vsel %vm344_vm4, %v259_v3, %v376_v6  ;;  %v307_v11 = vadd.f32 %v722_v48, %v306_v8  ;;  %v331_v12 = vadd.f32 %v722_v48, %v330_v9 }
  0xd8   : > { %440 = vst [vmem:[%s731_s29 + $0x28] sm:$0xff] %v408_v10  ;;  %v416_v13 = vsel %vm352_vm5, %v283_v4, %v384_v7 }
  0xd9   : > { %448 = vst [vmem:[%s731_s29 + $0x68] sm:$0xff] %v416_v13  ;;  %vm360_vm6 = vcmp.ge.f32.partialorder %v307_v11, 0.0  ;;  %v392_v14 = vmul.f32 0.01, %v307_v11  ;;  %vm368_vm7 = vcmp.ge.f32.partialorder %v331_v12, 0.0 }
  0xda   : > { %v400_v15 = vmul.f32 0.01, %v331_v12  ;;  %v261_v16 = vpop.f32.mrf.mxu0  ;;  %v285_v17 = vpop.f32.mrf.mxu1 }
  0xdb   : > { %v424_v18 = vsel %vm360_vm6, %v307_v11, %v392_v14  ;;  %v262_v19 = vadd.f32 %v722_v48, %v261_v16  ;;  %v286_v20 = vadd.f32 %v722_v48, %v285_v17 }
  0xdc   : > { %456 = vst [vmem:[%s731_s29 + $0xa8] sm:$0xff] %v424_v18  ;;  %v432_v21 = vsel %vm368_vm7, %v331_v12, %v400_v15 }
  0xdd   : > { %464 = vst [vmem:[%s731_s29 + $0xe8] sm:$0xff] %v432_v21  ;;  %vm345_vm8 = vcmp.ge.f32.partialorder %v262_v19, 0.0  ;;  %v377_v22 = vmul.f32 0.01, %v262_v19  ;;  %vm353_vm9 = vcmp.ge.f32.partialorder %v286_v20, 0.0 }
  0xde   : > { %v385_v23 = vmul.f32 0.01, %v286_v20  ;;  %v309_v24 = vpop.f32.mrf.mxu2  ;;  %v333_v25 = vpop.f32.mrf.mxu3 }
  0xdf   : > { %v409_v26 = vsel %vm345_vm8, %v262_v19, %v377_v22  ;;  %v310_v27 = vadd.f32 %v722_v48, %v309_v24  ;;  %v334_v28 = vadd.f32 %v722_v48, %v333_v25 }
  0xe0   : > { %441 = vst [vmem:[%s731_s29 + $0x30] sm:$0xff] %v409_v26  ;;  %v417_v29 = vsel %vm353_vm9, %v286_v20, %v385_v23 }
  0xe1   : > { %449 = vst [vmem:[%s731_s29 + $0x70] sm:$0xff] %v417_v29  ;;  %vm361_vm10 = vcmp.ge.f32.partialorder %v310_v27, 0.0  ;;  %v393_v30 = vmul.f32 0.01, %v310_v27  ;;  %vm369_vm11 = vcmp.ge.f32.partialorder %v334_v28, 0.0 }
  0xe2   : > { %v401_v31 = vmul.f32 0.01, %v334_v28  ;;  %v264_v32 = vpop.f32.mrf.mxu0  ;;  %v288_v33 = vpop.f32.mrf.mxu1 }
  0xe3   : > { %v425_v34 = vsel %vm361_vm10, %v310_v27, %v393_v30  ;;  %v265_v35 = vadd.f32 %v722_v48, %v264_v32  ;;  %v289_v36 = vadd.f32 %v722_v48, %v288_v33 }
  0xe4   : > { %457 = vst [vmem:[%s731_s29 + $0xb0] sm:$0xff] %v425_v34  ;;  %v433_v37 = vsel %vm369_vm11, %v334_v28, %v401_v31 }
  0xe5   : > { %465 = vst [vmem:[%s731_s29 + $0xf0] sm:$0xff] %v433_v37  ;;  %vm346_vm12 = vcmp.ge.f32.partialorder %v265_v35, 0.0  ;;  %v378_v38 = vmul.f32 0.01, %v265_v35  ;;  %vm354_vm13 = vcmp.ge.f32.partialorder %v289_v36, 0.0 }
  0xe6   : > { %v386_v39 = vmul.f32 0.01, %v289_v36  ;;  %v312_v40 = vpop.f32.mrf.mxu2  ;;  %v336_v41 = vpop.f32.mrf.mxu3 }
  0xe7   : > { %v410_v42 = vsel %vm346_vm12, %v265_v35, %v378_v38  ;;  %v313_v43 = vadd.f32 %v722_v48, %v312_v40  ;;  %v337_v44 = vadd.f32 %v722_v48, %v336_v41 }
  0xe8   : > { %442 = vst [vmem:[%s731_s29 + $0x38] sm:$0xff] %v410_v42  ;;  %v418_v45 = vsel %vm354_vm13, %v289_v36, %v386_v39 }
  0xe9   : > { %450 = vst [vmem:[%s731_s29 + $0x78] sm:$0xff] %v418_v45  ;;  %vm362_vm14 = vcmp.ge.f32.partialorder %v313_v43, 0.0  ;;  %v394_v46 = vmul.f32 0.01, %v313_v43  ;;  %vm370_vm15 = vcmp.ge.f32.partialorder %v337_v44, 0.0 }
  0xea   : > { %v402_v47 = vmul.f32 0.01, %v337_v44 }
  0xeb   : > { %v426_v49 = vsel %vm362_vm14, %v313_v43, %v394_v46 }
  0xec   : > { %458 = vst [vmem:[%s731_s29 + $0xb8] sm:$0xff] %v426_v49  ;;  %v434_v50 = vsel %vm370_vm15, %v337_v44, %v402_v47 }
  0xed   : > { %466 = vst [vmem:[%s731_s29 + $0xf8] sm:$0xff] %v434_v50 }
  0xee PF: > { %s13_s12 = sadd.s32 1, %s597_s12  }
  0xef   : > { %p10_p4 = scmp.ge.s32.totalorder %s13_s12, 4  }
  0xf1   :  { %12 = sbr.rel (!%p10_p4) target bundleno = 1 (0x1), region = 62 }

// kernel: discriminator_forward.5
= control target key start
LH: loop header
LB: loop body
LE: loop exit
PB: predicated region body
PF: predicated region fallthrough
CT: control target
= control target key end

     0   :  { %s417_s1 = inlined_call_operand.vmem [shape: f32[128,128], index: 1, kind: input, shape index: {}]   ;;  %s418_s2 = inlined_call_operand.vmem [shape: f32[1,128], index: 2, kind: input, shape index: {}]   ;;  %s419_s0 = inlined_call_operand.vmem [shape: f32[128,128], index: 0, kind: input, shape index: {}]   ;;  %s420_s3 = inlined_call_operand.vmem [shape: f32[128,128], index: 3, kind: output, shape index: {}]  }
   0x1   :  { %v45_v0 = vld [vmem:[%s417_s1 + $0x78] sm:$0xff]  ;;  %v44_v1 = vld [vmem:[%s417_s1 + $0x70] sm:$0xff]  ;;  %v43_v2 = vld [vmem:[%s417_s1 + $0x68] sm:$0xff] }
   0x2   :  { %184 = vmatpush.msra.mxu2 %v45_v0  ;;  %185 = vmatpush.msra.mxu3 %v45_v0  ;;  %v42_v3 = vld [vmem:[%s417_s1 + $0x60] sm:$0xff]  ;;  %v41_v4 = vld [vmem:[%s417_s1 + $0x58] sm:$0xff]  ;;  %v40_v5 = vld [vmem:[%s417_s1 + $0x50] sm:$0xff] }
   0x3   :  { %50 = vmatpush.msra.mxu0 %v45_v0  ;;  %183 = vmatpush.msra.mxu1 %v45_v0  ;;  %v39_v6 = vld [vmem:[%s417_s1 + $0x48] sm:$0xff]  ;;  %v38_v7 = vld [vmem:[%s417_s1 + $0x40] sm:$0xff]  ;;  %v37_v8 = vld [vmem:[%s417_s1 + $0x38] sm:$0xff] }
   0x4   :  { %187 = vmatpush.msra.mxu2 %v44_v1  ;;  %188 = vmatpush.msra.mxu3 %v44_v1  ;;  %v36_v9 = vld [vmem:[%s417_s1 + $0x30] sm:$0xff]  ;;  %v35_v10 = vld [vmem:[%s417_s1 + $0x28] sm:$0xff]  ;;  %v34_v11 = vld [vmem:[%s417_s1 + $0x20] sm:$0xff] }
   0x5   :  { %51 = vmatpush.msra.mxu0 %v44_v1  ;;  %186 = vmatpush.msra.mxu1 %v44_v1  ;;  %v33_v12 = vld [vmem:[%s417_s1 + $0x18] sm:$0xff]  ;;  %v32_v13 = vld [vmem:[%s417_s1 + $0x10] sm:$0xff]  ;;  %v31_v14 = vld [vmem:[%s417_s1 + $0x8] sm:$0xff] }
   0x6   :  { %190 = vmatpush.msra.mxu2 %v43_v2  ;;  %191 = vmatpush.msra.mxu3 %v43_v2  ;;  %v30_v15 = vld [vmem:[%s417_s1] sm:$0xff]  ;;  %v23_v20 = vld [vmem:[%s419_s0 + $0x48] sm:$0xff]  ;;  %v24_v24 = vld [vmem:[%s419_s0 + $0x50] sm:$0xff] }
   0x7   :  { %52 = vmatpush.msra.mxu0 %v43_v2  ;;  %189 = vmatpush.msra.mxu1 %v43_v2  ;;  %v22_v16 = vld [vmem:[%s419_s0 + $0x40] sm:$0xff]  ;;  %v27_v21 = vld [vmem:[%s419_s0 + $0x68] sm:$0xff]  ;;  %v28_v25 = vld [vmem:[%s419_s0 + $0x70] sm:$0xff] }
   0x8   :  { %193 = vmatpush.msra.mxu2 %v42_v3  ;;  %194 = vmatpush.msra.mxu3 %v42_v3  ;;  %v26_v17 = vld [vmem:[%s419_s0 + $0x60] sm:$0xff]  ;;  %v15_v22 = vld [vmem:[%s419_s0 + $0x8] sm:$0xff]  ;;  %v16_v26 = vld [vmem:[%s419_s0 + $0x10] sm:$0xff] }
   0x9   :  { %53 = vmatpush.msra.mxu0 %v42_v3  ;;  %192 = vmatpush.msra.mxu1 %v42_v3  ;;  %v14_v18 = vld [vmem:[%s419_s0] sm:$0xff]  ;;  %v19_v23 = vld [vmem:[%s419_s0 + $0x28] sm:$0xff]  ;;  %v20_v27 = vld [vmem:[%s419_s0 + $0x30] sm:$0xff] }
   0xa   :  { %196 = vmatpush.msra.mxu2 %v41_v4  ;;  %197 = vmatpush.msra.mxu3 %v41_v4  ;;  %v18_v19 = vld [vmem:[%s419_s0 + $0x20] sm:$0xff]  ;;  %v25_v28 = vld [vmem:[%s419_s0 + $0x58] sm:$0xff] }
   0xb   :  { %54 = vmatpush.msra.mxu0 %v41_v4  ;;  %195 = vmatpush.msra.mxu1 %v41_v4  ;;  %v29_v29 = vld [vmem:[%s419_s0 + $0x78] sm:$0xff]  ;;  %v351_v32 = vld [vmem:[%s418_s2] ss:$0 sm:$0xff] }
   0xc   :  { %199 = vmatpush.msra.mxu2 %v40_v5  ;;  %200 = vmatpush.msra.mxu3 %v40_v5  ;;  %v17_v30 = vld [vmem:[%s419_s0 + $0x18] sm:$0xff] }
   0xd   :  { %55 = vmatpush.msra.mxu0 %v40_v5  ;;  %198 = vmatpush.msra.mxu1 %v40_v5  ;;  %v21_v31 = vld [vmem:[%s419_s0 + $0x38] sm:$0xff] }
   0xe   :  { %202 = vmatpush.msra.mxu2 %v39_v6  ;;  %203 = vmatpush.msra.mxu3 %v39_v6 }
   0xf   :  { %56 = vmatpush.msra.mxu0 %v39_v6  ;;  %201 = vmatpush.msra.mxu1 %v39_v6 }
  0x10   :  { %205 = vmatpush.msra.mxu2 %v38_v7  ;;  %206 = vmatpush.msra.mxu3 %v38_v7 }
  0x11   :  { %57 = vmatpush.msra.mxu0 %v38_v7  ;;  %204 = vmatpush.msra.mxu1 %v38_v7 }
  0x12   :  { %208 = vmatpush.msra.mxu2 %v37_v8  ;;  %209 = vmatpush.msra.mxu3 %v37_v8 }
  0x13   :  { %58 = vmatpush.msra.mxu0 %v37_v8  ;;  %207 = vmatpush.msra.mxu1 %v37_v8 }
  0x14   :  { %211 = vmatpush.msra.mxu2 %v36_v9  ;;  %212 = vmatpush.msra.mxu3 %v36_v9 }
  0x15   :  { %59 = vmatpush.msra.mxu0 %v36_v9  ;;  %210 = vmatpush.msra.mxu1 %v36_v9 }
  0x16   :  { %214 = vmatpush.msra.mxu2 %v35_v10  ;;  %215 = vmatpush.msra.mxu3 %v35_v10 }
  0x17   :  { %60 = vmatpush.msra.mxu0 %v35_v10  ;;  %213 = vmatpush.msra.mxu1 %v35_v10 }
  0x18   :  { %217 = vmatpush.msra.mxu2 %v34_v11  ;;  %218 = vmatpush.msra.mxu3 %v34_v11 }
  0x19   :  { %61 = vmatpush.msra.mxu0 %v34_v11  ;;  %216 = vmatpush.msra.mxu1 %v34_v11 }
  0x1a   :  { %220 = vmatpush.msra.mxu2 %v33_v12  ;;  %221 = vmatpush.msra.mxu3 %v33_v12 }
  0x1b   :  { %62 = vmatpush.msra.mxu0 %v33_v12  ;;  %219 = vmatpush.msra.mxu1 %v33_v12 }
  0x1c   :  { %223 = vmatpush.msra.mxu2 %v32_v13  ;;  %224 = vmatpush.msra.mxu3 %v32_v13 }
  0x1d   :  { %63 = vmatpush.msra.mxu0 %v32_v13  ;;  %222 = vmatpush.msra.mxu1 %v32_v13 }
  0x1e   :  { %226 = vmatpush.msra.mxu2 %v31_v14  ;;  %227 = vmatpush.msra.mxu3 %v31_v14 }
  0x1f   :  { %64 = vmatpush.msra.mxu0 %v31_v14  ;;  %225 = vmatpush.msra.mxu1 %v31_v14 }
  0x20   :  { %229 = vmatpush.msra.mxu2 %v30_v15  ;;  %230 = vmatpush.msra.mxu3 %v30_v15 }
  0x21   :  { %90 = vmatmul.f32.vlgmr.msra.gmra.mxu2 %v22_v16  ;;  %102 = vmatmul.f32.vlgmr.msra.gmra.mxu3 %v26_v17 }
  0x22   :  { %65 = vmatpush.msra.mxu0 %v30_v15  ;;  %228 = vmatpush.msra.mxu1 %v30_v15 }
  0x23   :  { %66 = vmatmul.f32.vlgmr.msra.gmra.mxu0 %v14_v18  ;;  %78 = vmatmul.f32.vlgmr.msra.gmra.mxu1 %v18_v19 }
  0x29   :  { %93 = vmatmul.f32.gmra.mxu2 %v23_v20  ;;  %105 = vmatmul.f32.gmra.mxu3 %v27_v21 }
  0x2b   :  { %69 = vmatmul.f32.gmra.mxu0 %v15_v22  ;;  %81 = vmatmul.f32.gmra.mxu1 %v19_v23 }
  0x31   :  { %96 = vmatmul.f32.gmra.mxu2 %v24_v24  ;;  %108 = vmatmul.f32.gmra.mxu3 %v28_v25 }
  0x33   :  { %72 = vmatmul.f32.gmra.mxu0 %v16_v26  ;;  %84 = vmatmul.f32.gmra.mxu1 %v20_v27 }
  0x39   :  { %99 = vmatmul.f32.gmra.mxu2 %v25_v28  ;;  %111 = vmatmul.f32.gmra.mxu3 %v29_v29 }
  0x3b   :  { %75 = vmatmul.f32.gmra.mxu0 %v17_v30  ;;  %87 = vmatmul.f32.gmra.mxu1 %v21_v31 }
  0xa0   :  { %v67_v33 = vpop.f32.mrf.mxu0  ;;  %v79_v34 = vpop.f32.mrf.mxu1 }
  0xa1   :  { %v68_v35 = vadd.f32 %v351_v32, %v67_v33  ;;  %v80_v36 = vadd.f32 %v351_v32, %v79_v34 }
  0xa3   :  { %vm115_vm0 = vcmp.ge.f32.partialorder %v68_v35, 0.0  ;;  %v131_v37 = vmul.f32 0.01, %v68_v35  ;;  %vm119_vm1 = vcmp.ge.f32.partialorder %v80_v36, 0.0  ;;  %v135_v38 = vmul.f32 0.01, %v80_v36 }
  0xa4   :  { %v91_v39 = vpop.f32.mrf.mxu2  ;;  %v103_v40 = vpop.f32.mrf.mxu3 }
  0xa5   :  { %v147_v41 = vsel %vm115_vm0, %v68_v35, %v131_v37  ;;  %v151_v42 = vsel %vm119_vm1, %v80_v36, %v135_v38  ;;  %v92_v43 = vadd.f32 %v351_v32, %v91_v39  ;;  %v104_v44 = vadd.f32 %v351_v32, %v103_v40 }
  0xa6   :  { %163 = vst [vmem:[%s420_s3] sm:$0xff] %v147_v41 }
  0xa7   :  { %167 = vst [vmem:[%s420_s3 + $0x20] sm:$0xff] %v151_v42  ;;  %vm123_vm2 = vcmp.ge.f32.partialorder %v92_v43, 0.0  ;;  %v139_v45 = vmul.f32 0.01, %v92_v43  ;;  %vm127_vm3 = vcmp.ge.f32.partialorder %v104_v44, 0.0 }
  0xa8   :  { %v143_v46 = vmul.f32 0.01, %v104_v44  ;;  %v70_v47 = vpop.f32.mrf.mxu0  ;;  %v82_v48 = vpop.f32.mrf.mxu1 }
  0xa9   :  { %v155_v49 = vsel %vm123_vm2, %v92_v43, %v139_v45  ;;  %v71_v50 = vadd.f32 %v351_v32, %v70_v47  ;;  %v83_v51 = vadd.f32 %v351_v32, %v82_v48 }
  0xaa   :  { %171 = vst [vmem:[%s420_s3 + $0x40] sm:$0xff] %v155_v49  ;;  %v159_v52 = vsel %vm127_vm3, %v104_v44, %v143_v46 }
  0xab   :  { %175 = vst [vmem:[%s420_s3 + $0x60] sm:$0xff] %v159_v52  ;;  %vm116_vm4 = vcmp.ge.f32.partialorder %v71_v50, 0.0  ;;  %v132_v53 = vmul.f32 0.01, %v71_v50  ;;  %vm120_vm5 = vcmp.ge.f32.partialorder %v83_v51, 0.0 }
  0xac   :  { %v136_v54 = vmul.f32 0.01, %v83_v51  ;;  %v94_v55 = vpop.f32.mrf.mxu2  ;;  %v106_v56 = vpop.f32.mrf.mxu3 }
  0xad   :  { %v148_v57 = vsel %vm116_vm4, %v71_v50, %v132_v53  ;;  %v95_v58 = vadd.f32 %v351_v32, %v94_v55  ;;  %v107_v59 = vadd.f32 %v351_v32, %v106_v56 }
  0xae   :  { %164 = vst [vmem:[%s420_s3 + $0x8] sm:$0xff] %v148_v57  ;;  %v152_v60 = vsel %vm120_vm5, %v83_v51, %v136_v54 }
  0xaf   :  { %168 = vst [vmem:[%s420_s3 + $0x28] sm:$0xff] %v152_v60  ;;  %vm124_vm6 = vcmp.ge.f32.partialorder %v95_v58, 0.0  ;;  %v140_v61 = vmul.f32 0.01, %v95_v58  ;;  %vm128_vm7 = vcmp.ge.f32.partialorder %v107_v59, 0.0 }
  0xb0   :  { %v144_v62 = vmul.f32 0.01, %v107_v59  ;;  %v73_v63 = vpop.f32.mrf.mxu0  ;;  %v85_v0 = vpop.f32.mrf.mxu1 }
  0xb1   :  { %v156_v1 = vsel %vm124_vm6, %v95_v58, %v140_v61  ;;  %v74_v2 = vadd.f32 %v351_v32, %v73_v63  ;;  %v86_v3 = vadd.f32 %v351_v32, %v85_v0 }
  0xb2   :  { %172 = vst [vmem:[%s420_s3 + $0x48] sm:$0xff] %v156_v1  ;;  %v160_v4 = vsel %vm128_vm7, %v107_v59, %v144_v62 }
  0xb3   :  { %176 = vst [vmem:[%s420_s3 + $0x68] sm:$0xff] %v160_v4  ;;  %vm117_vm8 = vcmp.ge.f32.partialorder %v74_v2, 0.0  ;;  %v133_v5 = vmul.f32 0.01, %v74_v2  ;;  %vm121_vm9 = vcmp.ge.f32.partialorder %v86_v3, 0.0 }
  0xb4   :  { %v137_v6 = vmul.f32 0.01, %v86_v3  ;;  %v97_v7 = vpop.f32.mrf.mxu2  ;;  %v109_v8 = vpop.f32.mrf.mxu3 }
  0xb5   :  { %v149_v9 = vsel %vm117_vm8, %v74_v2, %v133_v5  ;;  %v98_v10 = vadd.f32 %v351_v32, %v97_v7  ;;  %v110_v11 = vadd.f32 %v351_v32, %v109_v8 }
  0xb6   :  { %165 = vst [vmem:[%s420_s3 + $0x10] sm:$0xff] %v149_v9  ;;  %v153_v12 = vsel %vm121_vm9, %v86_v3, %v137_v6 }
  0xb7   :  { %169 = vst [vmem:[%s420_s3 + $0x30] sm:$0xff] %v153_v12  ;;  %vm125_vm10 = vcmp.ge.f32.partialorder %v98_v10, 0.0  ;;  %v141_v13 = vmul.f32 0.01, %v98_v10  ;;  %vm129_vm11 = vcmp.ge.f32.partialorder %v110_v11, 0.0 }
  0xb8   :  { %v145_v14 = vmul.f32 0.01, %v110_v11  ;;  %v76_v15 = vpop.f32.mrf.mxu0  ;;  %v88_v16 = vpop.f32.mrf.mxu1 }
  0xb9   :  { %v157_v17 = vsel %vm125_vm10, %v98_v10, %v141_v13  ;;  %v77_v18 = vadd.f32 %v351_v32, %v76_v15  ;;  %v89_v19 = vadd.f32 %v351_v32, %v88_v16 }
  0xba   :  { %173 = vst [vmem:[%s420_s3 + $0x50] sm:$0xff] %v157_v17  ;;  %v161_v20 = vsel %vm129_vm11, %v110_v11, %v145_v14 }
  0xbb   :  { %177 = vst [vmem:[%s420_s3 + $0x70] sm:$0xff] %v161_v20  ;;  %vm118_vm12 = vcmp.ge.f32.partialorder %v77_v18, 0.0  ;;  %v134_v21 = vmul.f32 0.01, %v77_v18  ;;  %vm122_vm13 = vcmp.ge.f32.partialorder %v89_v19, 0.0 }
  0xbc   :  { %v138_v22 = vmul.f32 0.01, %v89_v19  ;;  %v100_v23 = vpop.f32.mrf.mxu2  ;;  %v112_v24 = vpop.f32.mrf.mxu3 }
  0xbd   :  { %v150_v25 = vsel %vm118_vm12, %v77_v18, %v134_v21  ;;  %v101_v26 = vadd.f32 %v351_v32, %v100_v23  ;;  %v113_v27 = vadd.f32 %v351_v32, %v112_v24 }
  0xbe   :  { %166 = vst [vmem:[%s420_s3 + $0x18] sm:$0xff] %v150_v25  ;;  %v154_v28 = vsel %vm122_vm13, %v89_v19, %v138_v22 }
  0xbf   :  { %170 = vst [vmem:[%s420_s3 + $0x38] sm:$0xff] %v154_v28  ;;  %vm126_vm14 = vcmp.ge.f32.partialorder %v101_v26, 0.0  ;;  %v142_v29 = vmul.f32 0.01, %v101_v26  ;;  %vm130_vm15 = vcmp.ge.f32.partialorder %v113_v27, 0.0 }
  0xc0   :  { %v146_v30 = vmul.f32 0.01, %v113_v27 }
  0xc1   :  { %v158_v31 = vsel %vm126_vm14, %v101_v26, %v142_v29 }
  0xc2   :  { %174 = vst [vmem:[%s420_s3 + $0x58] sm:$0xff] %v158_v31  ;;  %v162_v33 = vsel %vm130_vm15, %v113_v27, %v146_v30 }
  0xc3   :  { %178 = vst [vmem:[%s420_s3 + $0x78] sm:$0xff] %v162_v33 }

// kernel: discriminator_forward.6
= control target key start
LH: loop header
LB: loop body
LE: loop exit
PB: predicated region body
PF: predicated region fallthrough
CT: control target
= control target key end

     0   :  { %s324_s1 = inlined_call_operand.vmem [shape: f32[256,128], index: 1, kind: input, shape index: {}]   ;;  %s325_s2 = inlined_call_operand.vmem [shape: f32[1,128], index: 2, kind: input, shape index: {}]   ;;  %s326_s0 = inlined_call_operand.vmem [shape: f32[32,256], index: 0, kind: input, shape index: {}]   ;;  %s327_s3 = inlined_call_operand.vmem [shape: f32[32,128], index: 3, kind: output, shape index: {}]  }
   0x1   :  { %v37_v0 = vld [vmem:[%s324_s1 + $0x78] sm:$0xff]  ;;  %v36_v1 = vld [vmem:[%s324_s1 + $0x70] sm:$0xff]  ;;  %v35_v4 = vld [vmem:[%s324_s1 + $0x68] sm:$0xff] }
   0x2   :  { %v53_v2 = vld [vmem:[%s324_s1 + $0xf8] sm:$0xff]  ;;  %136 = vmatpush.msra.mxu2 %v37_v0  ;;  %v52_v3 = vld [vmem:[%s324_s1 + $0xf0] sm:$0xff]  ;;  %58 = vmatpush.msra.mxu0 %v37_v0  ;;  %v51_v5 = vld [vmem:[%s324_s1 + $0xe8] sm:$0xff] }
   0x3   :  { %152 = vmatpush.msra.mxu3 %v53_v2  ;;  %87 = vmatpush.msra.mxu1 %v53_v2  ;;  %v34_v6 = vld [vmem:[%s324_s1 + $0x60] sm:$0xff]  ;;  %v33_v8 = vld [vmem:[%s324_s1 + $0x58] sm:$0xff]  ;;  %v32_v10 = vld [vmem:[%s324_s1 + $0x50] sm:$0xff] }
   0x4   :  { %137 = vmatpush.msra.mxu2 %v36_v1  ;;  %59 = vmatpush.msra.mxu0 %v36_v1  ;;  %v50_v7 = vld [vmem:[%s324_s1 + $0xe0] sm:$0xff]  ;;  %v49_v9 = vld [vmem:[%s324_s1 + $0xd8] sm:$0xff]  ;;  %v48_v11 = vld [vmem:[%s324_s1 + $0xd0] sm:$0xff] }
   0x5   :  { %153 = vmatpush.msra.mxu3 %v52_v3  ;;  %88 = vmatpush.msra.mxu1 %v52_v3  ;;  %v31_v12 = vld [vmem:[%s324_s1 + $0x48] sm:$0xff]  ;;  %v30_v14 = vld [vmem:[%s324_s1 + $0x40] sm:$0xff]  ;;  %v29_v16 = vld [vmem:[%s324_s1 + $0x38] sm:$0xff] }
   0x6   :  { %138 = vmatpush.msra.mxu2 %v35_v4  ;;  %60 = vmatpush.msra.mxu0 %v35_v4  ;;  %v47_v13 = vld [vmem:[%s324_s1 + $0xc8] sm:$0xff]  ;;  %v46_v15 = vld [vmem:[%s324_s1 + $0xc0] sm:$0xff]  ;;  %v45_v17 = vld [vmem:[%s324_s1 + $0xb8] sm:$0xff] }
   0x7   :  { %154 = vmatpush.msra.mxu3 %v51_v5  ;;  %89 = vmatpush.msra.mxu1 %v51_v5  ;;  %v28_v18 = vld [vmem:[%s324_s1 + $0x30] sm:$0xff]  ;;  %v27_v20 = vld [vmem:[%s324_s1 + $0x28] sm:$0xff]  ;;  %v26_v22 = vld [vmem:[%s324_s1 + $0x20] sm:$0xff] }
   0x8   :  { %139 = vmatpush.msra.mxu2 %v34_v6  ;;  %61 = vmatpush.msra.mxu0 %v34_v6  ;;  %v44_v19 = vld [vmem:[%s324_s1 + $0xb0] sm:$0xff]  ;;  %v43_v21 = vld [vmem:[%s324_s1 + $0xa8] sm:$0xff]  ;;  %v42_v23 = vld [vmem:[%s324_s1 + $0xa0] sm:$0xff] }
   0x9   :  { %155 = vmatpush.msra.mxu3 %v50_v7  ;;  %90 = vmatpush.msra.mxu1 %v50_v7  ;;  %v25_v24 = vld [vmem:[%s324_s1 + $0x18] sm:$0xff]  ;;  %v24_v26 = vld [vmem:[%s324_s1 + $0x10] sm:$0xff]  ;;  %v23_v28 = vld [vmem:[%s324_s1 + $0x8] sm:$0xff] }
   0xa   :  { %140 = vmatpush.msra.mxu2 %v33_v8  ;;  %62 = vmatpush.msra.mxu0 %v33_v8  ;;  %v41_v25 = vld [vmem:[%s324_s1 + $0x98] sm:$0xff]  ;;  %v40_v27 = vld [vmem:[%s324_s1 + $0x90] sm:$0xff]  ;;  %v39_v29 = vld [vmem:[%s324_s1 + $0x88] sm:$0xff] }
   0xb   :  { %156 = vmatpush.msra.mxu3 %v49_v9  ;;  %91 = vmatpush.msra.mxu1 %v49_v9  ;;  %v22_v30 = vld [vmem:[%s324_s1] sm:$0xff]  ;;  %v19_v33 = vld [vmem:[%s326_s0 + $0x28] sm:$0xff]  ;;  %v20_v36 = vld [vmem:[%s326_s0 + $0x30] sm:$0xff] }
   0xc   :  { %141 = vmatpush.msra.mxu2 %v32_v10  ;;  %63 = vmatpush.msra.mxu0 %v32_v10  ;;  %v38_v31 = vld [vmem:[%s324_s1 + $0x80] sm:$0xff]  ;;  %v15_v35 = vld [vmem:[%s326_s0 + $0x8] sm:$0xff]  ;;  %v21_v37 = vld [vmem:[%s326_s0 + $0x38] sm:$0xff] }
   0xd   :  { %157 = vmatpush.msra.mxu3 %v48_v11  ;;  %92 = vmatpush.msra.mxu1 %v48_v11  ;;  %v18_v32 = vld [vmem:[%s326_s0 + $0x20] sm:$0xff]  ;;  %v16_v38 = vld [vmem:[%s326_s0 + $0x10] sm:$0xff]  ;;  %v17_v39 = vld [vmem:[%s326_s0 + $0x18] sm:$0xff] }
   0xe   :  { %142 = vmatpush.msra.mxu2 %v31_v12  ;;  %64 = vmatpush.msra.mxu0 %v31_v12  ;;  %v14_v34 = vld [vmem:[%s326_s0] sm:$0xff] }
   0xf   :  { %158 = vmatpush.msra.mxu3 %v47_v13  ;;  %93 = vmatpush.msra.mxu1 %v47_v13  ;;  %v168_v40 = vld [vmem:[%s325_s2] ss:$0 sm:$0xff] }
  0x10   :  { %143 = vmatpush.msra.mxu2 %v30_v14  ;;  %65 = vmatpush.msra.mxu0 %v30_v14 }
  0x11   :  { %159 = vmatpush.msra.mxu3 %v46_v15  ;;  %94 = vmatpush.msra.mxu1 %v46_v15 }
  0x12   :  { %144 = vmatpush.msra.mxu2 %v29_v16  ;;  %66 = vmatpush.msra.mxu0 %v29_v16 }
  0x13   :  { %160 = vmatpush.msra.mxu3 %v45_v17  ;;  %95 = vmatpush.msra.mxu1 %v45_v17 }
  0x14   :  { %145 = vmatpush.msra.mxu2 %v28_v18  ;;  %67 = vmatpush.msra.mxu0 %v28_v18 }
  0x15   :  { %161 = vmatpush.msra.mxu3 %v44_v19  ;;  %96 = vmatpush.msra.mxu1 %v44_v19 }
  0x16   :  { %146 = vmatpush.msra.mxu2 %v27_v20  ;;  %68 = vmatpush.msra.mxu0 %v27_v20 }
  0x17   :  { %162 = vmatpush.msra.mxu3 %v43_v21  ;;  %97 = vmatpush.msra.mxu1 %v43_v21 }
  0x18   :  { %147 = vmatpush.msra.mxu2 %v26_v22  ;;  %69 = vmatpush.msra.mxu0 %v26_v22 }
  0x19   :  { %163 = vmatpush.msra.mxu3 %v42_v23  ;;  %98 = vmatpush.msra.mxu1 %v42_v23 }
  0x1a   :  { %148 = vmatpush.msra.mxu2 %v25_v24  ;;  %70 = vmatpush.msra.mxu0 %v25_v24 }
  0x1b   :  { %164 = vmatpush.msra.mxu3 %v41_v25  ;;  %99 = vmatpush.msra.mxu1 %v41_v25 }
  0x1c   :  { %149 = vmatpush.msra.mxu2 %v24_v26  ;;  %71 = vmatpush.msra.mxu0 %v24_v26 }
  0x1d   :  { %165 = vmatpush.msra.mxu3 %v40_v27  ;;  %100 = vmatpush.msra.mxu1 %v40_v27 }
  0x1e   :  { %150 = vmatpush.msra.mxu2 %v23_v28  ;;  %72 = vmatpush.msra.mxu0 %v23_v28 }
  0x1f   :  { %166 = vmatpush.msra.mxu3 %v39_v29  ;;  %101 = vmatpush.msra.mxu1 %v39_v29 }
  0x20   :  { %151 = vmatpush.msra.mxu2 %v22_v30  ;;  %73 = vmatpush.msra.mxu0 %v22_v30 }
  0x21   :  { %167 = vmatpush.msra.mxu3 %v38_v31  ;;  %80 = vmatmul.f32.vlgmr.msra.gmra.mxu2 %v18_v32 }
  0x22   :  { %109 = vmatmul.f32.vlgmr.msra.gmra.mxu3 %v19_v33  ;;  %102 = vmatpush.msra.mxu1 %v38_v31 }
  0x23   :  { %74 = vmatmul.f32.vlgmr.msra.gmra.mxu0 %v14_v34  ;;  %103 = vmatmul.f32.vlgmr.msra.gmra.mxu1 %v15_v35 }
  0x29   :  { %83 = vmatmul.f32.gmra.mxu2 %v20_v36 }
  0x2a   :  { %112 = vmatmul.f32.gmra.mxu3 %v21_v37 }
  0x2b   :  { %77 = vmatmul.f32.gmra.mxu0 %v16_v38  ;;  %106 = vmatmul.f32.gmra.mxu1 %v17_v39 }
  0xa0   :  { %v75_v41 = vpop.f32.mrf.mxu0  ;;  %v104_v42 = vpop.f32.mrf.mxu1 }
  0xa1   :  { %v76_v43 = vadd.f32 %v168_v40, %v75_v41 }
  0xa3   :  { %v105_v44 = vadd.f32 %v104_v42, %v76_v43 }
  0xa4   :  { %v81_v45 = vpop.f32.mrf.mxu2 }
  0xa5   :  { %v110_v46 = vpop.f32.mrf.mxu3  ;;  %v82_v47 = vadd.f32 %v168_v40, %v81_v45  ;;  %vm116_vm0 = vcmp.ge.f32.partialorder %v105_v44, 0.0  ;;  %v120_v48 = vmul.f32 0.01, %v105_v44 }
  0xa7   :  { %v124_v49 = vsel %vm116_vm0, %v105_v44, %v120_v48  ;;  %v111_v50 = vadd.f32 %v110_v46, %v82_v47 }
  0xa8   :  { %128 = vst [vmem:[%s327_s3] sm:$0xff] %v124_v49  ;;  %v78_v51 = vpop.f32.mrf.mxu0  ;;  %v107_v52 = vpop.f32.mrf.mxu1 }
  0xa9   :  { %vm118_vm1 = vcmp.ge.f32.partialorder %v111_v50, 0.0  ;;  %v122_v53 = vmul.f32 0.01, %v111_v50  ;;  %v79_v54 = vadd.f32 %v168_v40, %v78_v51 }
  0xab   :  { %v126_v55 = vsel %vm118_vm1, %v111_v50, %v122_v53  ;;  %v108_v56 = vadd.f32 %v107_v52, %v79_v54 }
  0xac   :  { %130 = vst [vmem:[%s327_s3 + $0x10] sm:$0xff] %v126_v55  ;;  %v84_v57 = vpop.f32.mrf.mxu2 }
  0xad   :  { %v113_v58 = vpop.f32.mrf.mxu3  ;;  %v85_v59 = vadd.f32 %v168_v40, %v84_v57  ;;  %vm117_vm2 = vcmp.ge.f32.partialorder %v108_v56, 0.0  ;;  %v121_v60 = vmul.f32 0.01, %v108_v56 }
  0xaf   :  { %v125_v61 = vsel %vm117_vm2, %v108_v56, %v121_v60  ;;  %v114_v62 = vadd.f32 %v113_v58, %v85_v59 }
  0xb0   :  { %129 = vst [vmem:[%s327_s3 + $0x8] sm:$0xff] %v125_v61 }
  0xb1   :  { %vm119_vm3 = vcmp.ge.f32.partialorder %v114_v62, 0.0  ;;  %v123_v63 = vmul.f32 0.01, %v114_v62 }
  0xb3   :  { %v127_v0 = vsel %vm119_vm3, %v114_v62, %v123_v63 }
  0xb4   :  { %131 = vst [vmem:[%s327_s3 + $0x18] sm:$0xff] %v127_v0 }

// kernel: discriminator_forward.7
= control target key start
LH: loop header
LB: loop body
LE: loop exit
PB: predicated region body
PF: predicated region fallthrough
CT: control target
= control target key end

     0   :  { %s756_s1 = inlined_call_operand.vmem [shape: f32[384,128], index: 1, kind: input, shape index: {}]   ;;  %s757_s3 = inlined_call_operand.vmem [shape: f32[512,128], index: 3, kind: input, shape index: {}]   ;;  %s758_s0 = inlined_call_operand.vmem [shape: f32[32,384], index: 0, kind: input, shape index: {}]   ;;  %s759_s2 = inlined_call_operand.vmem [shape: f32[8,512], index: 2, kind: input, shape index: {}]   ;;  %s760_s4 = inlined_call_operand.vmem [shape: f32[32,128], index: 4, kind: output, shape index: {0}]   ;;  %s761_s5 = inlined_call_operand.vmem [shape: f32[8,128], index: 5, kind: output, shape index: {1}]  }
   0x1   :  { %v78_v0 = vld [vmem:[%s756_s1 + $0x178] sm:$0xff]  ;;  %v77_v3 = vld [vmem:[%s756_s1 + $0x170] sm:$0xff]  ;;  %v76_v6 = vld [vmem:[%s756_s1 + $0x168] sm:$0xff] }
   0x2   :  { %v46_v1 = vld [vmem:[%s756_s1 + $0x78] sm:$0xff]  ;;  %137 = vmatpush.msra.mxu2 %v78_v0  ;;  %v45_v4 = vld [vmem:[%s756_s1 + $0x70] sm:$0xff]  ;;  %v44_v7 = vld [vmem:[%s756_s1 + $0x68] sm:$0xff] }
   0x3   :  { %v62_v2 = vld [vmem:[%s756_s1 + $0xf8] sm:$0xff]  ;;  %79 = vmatpush.msra.mxu0 %v46_v1  ;;  %v61_v5 = vld [vmem:[%s756_s1 + $0xf0] sm:$0xff]  ;;  %v60_v8 = vld [vmem:[%s756_s1 + $0xe8] sm:$0xff] }
   0x4   :  { %108 = vmatpush.msra.mxu1 %v62_v2  ;;  %138 = vmatpush.msra.mxu2 %v77_v3  ;;  %v75_v9 = vld [vmem:[%s756_s1 + $0x160] sm:$0xff]  ;;  %v74_v12 = vld [vmem:[%s756_s1 + $0x158] sm:$0xff]  ;;  %v73_v15 = vld [vmem:[%s756_s1 + $0x150] sm:$0xff] }
   0x5   :  { %80 = vmatpush.msra.mxu0 %v45_v4  ;;  %v43_v10 = vld [vmem:[%s756_s1 + $0x60] sm:$0xff]  ;;  %v42_v13 = vld [vmem:[%s756_s1 + $0x58] sm:$0xff]  ;;  %v41_v16 = vld [vmem:[%s756_s1 + $0x50] sm:$0xff] }
   0x6   :  { %109 = vmatpush.msra.mxu1 %v61_v5  ;;  %139 = vmatpush.msra.mxu2 %v76_v6  ;;  %v59_v11 = vld [vmem:[%s756_s1 + $0xe0] sm:$0xff]  ;;  %v58_v14 = vld [vmem:[%s756_s1 + $0xd8] sm:$0xff]  ;;  %v57_v17 = vld [vmem:[%s756_s1 + $0xd0] sm:$0xff] }
   0x7   :  { %81 = vmatpush.msra.mxu0 %v44_v7  ;;  %v72_v18 = vld [vmem:[%s756_s1 + $0x148] sm:$0xff]  ;;  %v71_v21 = vld [vmem:[%s756_s1 + $0x140] sm:$0xff]  ;;  %v70_v24 = vld [vmem:[%s756_s1 + $0x138] sm:$0xff] }
   0x8   :  { %110 = vmatpush.msra.mxu1 %v60_v8  ;;  %140 = vmatpush.msra.mxu2 %v75_v9  ;;  %v40_v19 = vld [vmem:[%s756_s1 + $0x48] sm:$0xff]  ;;  %v39_v22 = vld [vmem:[%s756_s1 + $0x40] sm:$0xff]  ;;  %v38_v25 = vld [vmem:[%s756_s1 + $0x38] sm:$0xff] }
   0x9   :  { %82 = vmatpush.msra.mxu0 %v43_v10  ;;  %v56_v20 = vld [vmem:[%s756_s1 + $0xc8] sm:$0xff]  ;;  %v55_v23 = vld [vmem:[%s756_s1 + $0xc0] sm:$0xff]  ;;  %v189_v26 = vld [vmem:[%s757_s3 + $0x78] sm:$0xff] }
   0xa   :  { %111 = vmatpush.msra.mxu1 %v59_v11  ;;  %141 = vmatpush.msra.mxu2 %v74_v12  ;;  %v54_v27 = vld [vmem:[%s756_s1 + $0xb8] sm:$0xff]  ;;  %v188_v28 = vld [vmem:[%s757_s3 + $0x70] sm:$0xff]  ;;  %v187_v32 = vld [vmem:[%s757_s3 + $0x68] sm:$0xff] }
   0xb   :  { %83 = vmatpush.msra.mxu0 %v42_v13  ;;  %v69_v29 = vld [vmem:[%s756_s1 + $0x130] sm:$0xff]  ;;  %238 = vmatpush.msra.mxu3 %v189_v26  ;;  %v68_v33 = vld [vmem:[%s756_s1 + $0x128] sm:$0xff]  ;;  %v186_v36 = vld [vmem:[%s757_s3 + $0x60] sm:$0xff] }
   0xc   :  { %112 = vmatpush.msra.mxu1 %v58_v14  ;;  %142 = vmatpush.msra.mxu2 %v73_v15  ;;  %v37_v30 = vld [vmem:[%s756_s1 + $0x30] sm:$0xff]  ;;  %v36_v34 = vld [vmem:[%s756_s1 + $0x28] sm:$0xff]  ;;  %v67_v37 = vld [vmem:[%s756_s1 + $0x120] sm:$0xff] }
   0xd   :  { %84 = vmatpush.msra.mxu0 %v41_v16  ;;  %v53_v31 = vld [vmem:[%s756_s1 + $0xb0] sm:$0xff]  ;;  %239 = vmatpush.msra.mxu3 %v188_v28  ;;  %v52_v35 = vld [vmem:[%s756_s1 + $0xa8] sm:$0xff]  ;;  %v35_v38 = vld [vmem:[%s756_s1 + $0x20] sm:$0xff] }
   0xe   :  { %113 = vmatpush.msra.mxu1 %v57_v17  ;;  %143 = vmatpush.msra.mxu2 %v72_v18  ;;  %v51_v39 = vld [vmem:[%s756_s1 + $0xa0] sm:$0xff]  ;;  %v185_v40 = vld [vmem:[%s757_s3 + $0x58] sm:$0xff]  ;;  %v184_v44 = vld [vmem:[%s757_s3 + $0x50] sm:$0xff] }
   0xf   :  { %85 = vmatpush.msra.mxu0 %v40_v19  ;;  %240 = vmatpush.msra.mxu3 %v187_v32  ;;  %v66_v41 = vld [vmem:[%s756_s1 + $0x118] sm:$0xff]  ;;  %v65_v45 = vld [vmem:[%s756_s1 + $0x110] sm:$0xff]  ;;  %v183_v48 = vld [vmem:[%s757_s3 + $0x48] sm:$0xff] }
  0x10   :  { %114 = vmatpush.msra.mxu1 %v56_v20  ;;  %144 = vmatpush.msra.mxu2 %v71_v21  ;;  %v34_v42 = vld [vmem:[%s756_s1 + $0x18] sm:$0xff]  ;;  %v33_v46 = vld [vmem:[%s756_s1 + $0x10] sm:$0xff]  ;;  %v64_v49 = vld [vmem:[%s756_s1 + $0x108] sm:$0xff] }
  0x11   :  { %86 = vmatpush.msra.mxu0 %v39_v22  ;;  %241 = vmatpush.msra.mxu3 %v186_v36  ;;  %v50_v43 = vld [vmem:[%s756_s1 + $0x98] sm:$0xff]  ;;  %v49_v47 = vld [vmem:[%s756_s1 + $0x90] sm:$0xff]  ;;  %v32_v50 = vld [vmem:[%s756_s1 + $0x8] sm:$0xff] }
  0x12   :  { %115 = vmatpush.msra.mxu1 %v55_v23  ;;  %145 = vmatpush.msra.mxu2 %v70_v24  ;;  %v48_v51 = vld [vmem:[%s756_s1 + $0x88] sm:$0xff]  ;;  %v182_v52 = vld [vmem:[%s757_s3 + $0x40] sm:$0xff]  ;;  %v21_v55 = vld [vmem:[%s758_s0 + $0x10] sm:$0xff] }
  0x13   :  { %87 = vmatpush.msra.mxu0 %v38_v25  ;;  %242 = vmatpush.msra.mxu3 %v185_v40  ;;  %v63_v53 = vld [vmem:[%s756_s1 + $0x100] sm:$0xff]  ;;  %v237_v57 = vld [vmem:[%s757_s3 + $0x1f8] sm:$0xff]  ;;  %v20_v59 = vld [vmem:[%s758_s0 + $0x8] sm:$0xff] }
  0x14   :  { %116 = vmatpush.msra.mxu1 %v54_v27  ;;  %146 = vmatpush.msra.mxu2 %v69_v29  ;;  %v31_v54 = vld [vmem:[%s756_s1] sm:$0xff]  ;;  %v205_v60 = vld [vmem:[%s757_s3 + $0xf8] sm:$0xff]  ;;  %v236_v61 = vld [vmem:[%s757_s3 + $0x1f0] sm:$0xff] }
  0x15   :  { %88 = vmatpush.msra.mxu0 %v37_v30  ;;  %243 = vmatpush.msra.mxu3 %v184_v44  ;;  %v47_v56 = vld [vmem:[%s756_s1 + $0x80] sm:$0xff]  ;;  %v221_v62 = vld [vmem:[%s757_s3 + $0x178] sm:$0xff]  ;;  %v204_v63 = vld [vmem:[%s757_s3 + $0xf0] sm:$0xff] }
  0x16   :  { %117 = vmatpush.msra.mxu1 %v53_v31  ;;  %147 = vmatpush.msra.mxu2 %v68_v33  ;;  %v19_v58 = vld [vmem:[%s758_s0] sm:$0xff]  ;;  %v181_v0 = vld [vmem:[%s757_s3 + $0x38] sm:$0xff]  ;;  %v235_v1 = vld [vmem:[%s757_s3 + $0x1e8] sm:$0xff] }
  0x17   :  { %89 = vmatpush.msra.mxu0 %v36_v34  ;;  %244 = vmatpush.msra.mxu3 %v183_v48  ;;  %v220_v2 = vld [vmem:[%s757_s3 + $0x170] sm:$0xff]  ;;  %v203_v3 = vld [vmem:[%s757_s3 + $0xe8] sm:$0xff]  ;;  %v234_v5 = vld [vmem:[%s757_s3 + $0x1e0] sm:$0xff] }
  0x18   :  { %118 = vmatpush.msra.mxu1 %v52_v35  ;;  %148 = vmatpush.msra.mxu2 %v67_v37  ;;  %v180_v4 = vld [vmem:[%s757_s3 + $0x30] sm:$0xff]  ;;  %v219_v6 = vld [vmem:[%s757_s3 + $0x168] sm:$0xff]  ;;  %v202_v8 = vld [vmem:[%s757_s3 + $0xe0] sm:$0xff] }
  0x19   :  { %90 = vmatpush.msra.mxu0 %v35_v38  ;;  %245 = vmatpush.msra.mxu3 %v182_v52  ;;  %v24_v7 = vld [vmem:[%s758_s0 + $0x28] sm:$0xff]  ;;  %v233_v9 = vld [vmem:[%s757_s3 + $0x1d8] sm:$0xff]  ;;  %v23_v11 = vld [vmem:[%s758_s0 + $0x20] sm:$0xff] }
  0x1a   :  { %119 = vmatpush.msra.mxu1 %v51_v39  ;;  %149 = vmatpush.msra.mxu2 %v66_v41  ;;  %v22_v10 = vld [vmem:[%s758_s0 + $0x18] sm:$0xff]  ;;  %v218_v13 = vld [vmem:[%s757_s3 + $0x160] sm:$0xff]  ;;  %v232_v14 = vld [vmem:[%s757_s3 + $0x1d0] sm:$0xff] }
  0x1b   :  { %91 = vmatpush.msra.mxu0 %v34_v42  ;;  %246 = vmatpush.msra.mxu3 %v181_v0  ;;  %v201_v12 = vld [vmem:[%s757_s3 + $0xd8] sm:$0xff]  ;;  %v200_v15 = vld [vmem:[%s757_s3 + $0xd0] sm:$0xff]  ;;  %v179_v16 = vld [vmem:[%s757_s3 + $0x28] sm:$0xff] }
  0x1c   :  { %120 = vmatpush.msra.mxu1 %v50_v43  ;;  %150 = vmatpush.msra.mxu2 %v65_v45  ;;  %v217_v17 = vld [vmem:[%s757_s3 + $0x158] sm:$0xff]  ;;  %v231_v18 = vld [vmem:[%s757_s3 + $0x1c8] sm:$0xff]  ;;  %v178_v20 = vld [vmem:[%s757_s3 + $0x20] sm:$0xff] }
  0x1d   :  { %92 = vmatpush.msra.mxu0 %v33_v46  ;;  %247 = vmatpush.msra.mxu3 %v180_v4  ;;  %v199_v19 = vld [vmem:[%s757_s3 + $0xc8] sm:$0xff]  ;;  %v216_v21 = vld [vmem:[%s757_s3 + $0x150] sm:$0xff]  ;;  %v230_v22 = vld [vmem:[%s757_s3 + $0x1c0] sm:$0xff] }
  0x1e   :  { %121 = vmatpush.msra.mxu1 %v49_v47  ;;  %151 = vmatpush.msra.mxu2 %v64_v49  ;;  %v27_v23 = vld [vmem:[%s758_s0 + $0x40] sm:$0xff]  ;;  %v215_v25 = vld [vmem:[%s757_s3 + $0x148] sm:$0xff]  ;;  %v229_v26 = vld [vmem:[%s757_s3 + $0x1b8] sm:$0xff] }
  0x1f   :  { %93 = vmatpush.msra.mxu0 %v32_v50  ;;  %248 = vmatpush.msra.mxu3 %v179_v16  ;;  %v198_v24 = vld [vmem:[%s757_s3 + $0xc0] sm:$0xff]  ;;  %v25_v27 = vld [vmem:[%s758_s0 + $0x30] sm:$0xff]  ;;  %v26_v28 = vld [vmem:[%s758_s0 + $0x38] sm:$0xff] }
  0x20   :  { %122 = vmatpush.msra.mxu1 %v48_v51  ;;  %152 = vmatpush.msra.mxu2 %v63_v53  ;;  %v197_v29 = vld [vmem:[%s757_s3 + $0xb8] sm:$0xff]  ;;  %v214_v30 = vld [vmem:[%s757_s3 + $0x140] sm:$0xff]  ;;  %v228_v31 = vld [vmem:[%s757_s3 + $0x1b0] sm:$0xff] }
  0x21   :  { %94 = vmatpush.msra.mxu0 %v31_v54  ;;  %153 = vmatmul.f32.vlgmr.msra.gmra.mxu2 %v21_v55  ;;  %v177_v32 = vld [vmem:[%s757_s3 + $0x18] sm:$0xff]  ;;  %v196_v33 = vld [vmem:[%s757_s3 + $0xb0] sm:$0xff]  ;;  %v227_v35 = vld [vmem:[%s757_s3 + $0x1a8] sm:$0xff] }
  0x22   :  { %123 = vmatpush.msra.mxu1 %v47_v56  ;;  %298 = vmatpush.msrb.mxu2 %v237_v57  ;;  %v213_v34 = vld [vmem:[%s757_s3 + $0x138] sm:$0xff]  ;;  %v176_v36 = vld [vmem:[%s757_s3 + $0x10] sm:$0xff]  ;;  %v195_v37 = vld [vmem:[%s757_s3 + $0xa8] sm:$0xff] }
  0x23   :  { %95 = vmatmul.f32.vlgmr.msra.gmra.mxu0 %v19_v58  ;;  %124 = vmatmul.f32.vlgmr.msra.gmra.mxu1 %v20_v59  ;;  %v212_v38 = vld [vmem:[%s757_s3 + $0x130] sm:$0xff]  ;;  %v226_v39 = vld [vmem:[%s757_s3 + $0x1a0] sm:$0xff]  ;;  %v175_v40 = vld [vmem:[%s757_s3 + $0x8] sm:$0xff] }
  0x24   :  { %258 = vmatpush.msrb.mxu0 %v205_v60  ;;  %299 = vmatpush.msrb.mxu2 %v236_v61  ;;  %v30_v41 = vld [vmem:[%s758_s0 + $0x58] sm:$0xff]  ;;  %v194_v42 = vld [vmem:[%s757_s3 + $0xa0] sm:$0xff]  ;;  %v211_v43 = vld [vmem:[%s757_s3 + $0x128] sm:$0xff] }
  0x25   :  { %278 = vmatpush.msrb.mxu1 %v221_v62  ;;  %249 = vmatpush.msra.mxu3 %v178_v20  ;;  %v225_v44 = vld [vmem:[%s757_s3 + $0x198] sm:$0xff]  ;;  %v28_v45 = vld [vmem:[%s758_s0 + $0x48] sm:$0xff]  ;;  %v29_v46 = vld [vmem:[%s758_s0 + $0x50] sm:$0xff] }
  0x26   :  { %259 = vmatpush.msrb.mxu0 %v204_v63  ;;  %300 = vmatpush.msrb.mxu2 %v235_v1  ;;  %v193_v47 = vld [vmem:[%s757_s3 + $0x98] sm:$0xff]  ;;  %v210_v48 = vld [vmem:[%s757_s3 + $0x120] sm:$0xff]  ;;  %v224_v49 = vld [vmem:[%s757_s3 + $0x190] sm:$0xff] }
  0x27   :  { %279 = vmatpush.msrb.mxu1 %v220_v2  ;;  %250 = vmatpush.msra.mxu3 %v177_v32  ;;  %v174_v50 = vld [vmem:[%s757_s3] sm:$0xff]  ;;  %v192_v52 = vld [vmem:[%s757_s3 + $0x90] sm:$0xff]  ;;  %v209_v53 = vld [vmem:[%s757_s3 + $0x118] sm:$0xff] }
  0x28   :  { %260 = vmatpush.msrb.mxu0 %v203_v3  ;;  %301 = vmatpush.msrb.mxu2 %v234_v5  ;;  %v170_v51 = vld [vmem:[%s759_s2] sm:$0xff]  ;;  %v223_v54 = vld [vmem:[%s757_s3 + $0x188] sm:$0xff]  ;;  %v208_v56 = vld [vmem:[%s757_s3 + $0x110] sm:$0xff] }
  0x29   :  { %280 = vmatpush.msrb.mxu1 %v219_v6  ;;  %156 = vmatmul.f32.gmra.mxu2 %v24_v7  ;;  %v191_v55 = vld [vmem:[%s757_s3 + $0x88] sm:$0xff]  ;;  %v222_v57 = vld [vmem:[%s757_s3 + $0x180] sm:$0xff]  ;;  %v173_v59 = vld [vmem:[%s759_s2 + $0x18] sm:$0xff] }
  0x2a   :  { %261 = vmatpush.msrb.mxu0 %v202_v8  ;;  %302 = vmatpush.msrb.mxu2 %v233_v9  ;;  %v190_v58 = vld [vmem:[%s757_s3 + $0x80] sm:$0xff]  ;;  %v207_v60 = vld [vmem:[%s757_s3 + $0x108] sm:$0xff]  ;;  %v172_v63 = vld [vmem:[%s759_s2 + $0x10] sm:$0xff] }
  0x2b   :  { %98 = vmatmul.f32.gmra.mxu0 %v22_v10  ;;  %127 = vmatmul.f32.gmra.mxu1 %v23_v11  ;;  %v171_v61 = vld [vmem:[%s759_s2 + $0x8] sm:$0xff]  ;;  %v206_v62 = vld [vmem:[%s757_s3 + $0x100] sm:$0xff] }
  0x2c   :  { %262 = vmatpush.msrb.mxu0 %v201_v12  ;;  %281 = vmatpush.msrb.mxu1 %v218_v13 }
  0x2d   :  { %303 = vmatpush.msrb.mxu2 %v232_v14  ;;  %251 = vmatpush.msra.mxu3 %v176_v36 }
  0x2e   :  { %263 = vmatpush.msrb.mxu0 %v200_v15  ;;  %282 = vmatpush.msrb.mxu1 %v217_v17 }
  0x2f   :  { %304 = vmatpush.msrb.mxu2 %v231_v18  ;;  %252 = vmatpush.msra.mxu3 %v175_v40 }
  0x30   :  { %264 = vmatpush.msrb.mxu0 %v199_v19  ;;  %283 = vmatpush.msrb.mxu1 %v216_v21 }
  0x31   :  { %305 = vmatpush.msrb.mxu2 %v230_v22  ;;  %253 = vmatpush.msra.mxu3 %v174_v50 }
  0x32   :  { %159 = vmatmul.f32.gmra.mxu2 %v27_v23  ;;  %265 = vmatpush.msrb.mxu0 %v198_v24 }
  0x33   :  { %284 = vmatpush.msrb.mxu1 %v215_v25  ;;  %306 = vmatpush.msrb.mxu2 %v229_v26 }
  0x34   :  { %101 = vmatmul.f32.gmra.mxu0 %v25_v27  ;;  %130 = vmatmul.f32.gmra.mxu1 %v26_v28 }
  0x35   :  { %266 = vmatpush.msrb.mxu0 %v197_v29  ;;  %285 = vmatpush.msrb.mxu1 %v214_v30 }
  0x36   :  { %307 = vmatpush.msrb.mxu2 %v228_v31  ;;  %254 = vmatmul.f32.vlgmr.msra.gmra.mxu3 %v170_v51 }
  0x37   :  { %267 = vmatpush.msrb.mxu0 %v196_v33  ;;  %286 = vmatpush.msrb.mxu1 %v213_v34 }
  0x38   :  { %308 = vmatpush.msrb.mxu2 %v227_v35 }
  0x39   :  { %268 = vmatpush.msrb.mxu0 %v195_v37  ;;  %287 = vmatpush.msrb.mxu1 %v212_v38 }
  0x3a   :  { %309 = vmatpush.msrb.mxu2 %v226_v39 }
  0x3b   :  { %162 = vmatmul.f32.gmra.mxu2 %v30_v41  ;;  %269 = vmatpush.msrb.mxu0 %v194_v42 }
  0x3c   :  { %288 = vmatpush.msrb.mxu1 %v211_v43  ;;  %310 = vmatpush.msrb.mxu2 %v225_v44 }
  0x3d   :  { %104 = vmatmul.f32.gmra.mxu0 %v28_v45  ;;  %133 = vmatmul.f32.gmra.mxu1 %v29_v46 }
  0x3e   :  { %270 = vmatpush.msrb.mxu0 %v193_v47  ;;  %289 = vmatpush.msrb.mxu1 %v210_v48 }
  0x3f   :  { %311 = vmatpush.msrb.mxu2 %v224_v49 }
  0x40   :  { %271 = vmatpush.msrb.mxu0 %v192_v52  ;;  %290 = vmatpush.msrb.mxu1 %v209_v53 }
  0x41   :  { %312 = vmatpush.msrb.mxu2 %v223_v54 }
  0x42   :  { %272 = vmatpush.msrb.mxu0 %v191_v55  ;;  %291 = vmatpush.msrb.mxu1 %v208_v56 }
  0x43   :  { %313 = vmatpush.msrb.mxu2 %v222_v57 }
  0x44   :  { %273 = vmatpush.msrb.mxu0 %v190_v58  ;;  %314 = vmatmul.f32.vlgmr.msrb.gmra.mxu2 %v173_v59 }
  0x45   :  { %292 = vmatpush.msrb.mxu1 %v207_v60  ;;  %274 = vmatmul.f32.vlgmr.msrb.gmra.mxu0 %v171_v61 }
  0x47   :  { %293 = vmatpush.msrb.mxu1 %v206_v62 }
  0x48   :  { %294 = vmatmul.f32.vlgmr.msrb.gmra.mxu1 %v172_v63 }
  0xa0   :  { %v96_v0 = vpop.f32.mrf.mxu0  ;;  %v125_v1 = vpop.f32.mrf.mxu1 }
  0xa1   :  { %v126_v2 = vadd.f32 %v125_v1, %v96_v0 }
  0xa4   :  { %v154_v3 = vpop.f32.mrf.mxu2 }
  0xa5   :  { %v155_v4 = vadd.f32 %v154_v3, %v126_v2 }
  0xa7   :  { %166 = vst [vmem:[%s760_s4] sm:$0xff] %v155_v4 }
  0xa8   :  { %v99_v5 = vpop.f32.mrf.mxu0  ;;  %v128_v6 = vpop.f32.mrf.mxu1 }
  0xa9   :  { %v129_v7 = vadd.f32 %v128_v6, %v99_v5 }
  0xac   :  { %v157_v8 = vpop.f32.mrf.mxu2 }
  0xad   :  { %v158_v9 = vadd.f32 %v157_v8, %v129_v7 }
  0xaf   :  { %167 = vst [vmem:[%s760_s4 + $0x8] sm:$0xff] %v158_v9 }
  0xb1   :  { %v102_v10 = vpop.f32.mrf.mxu0  ;;  %v131_v11 = vpop.f32.mrf.mxu1 }
  0xb2   :  { %v132_v12 = vadd.f32 %v131_v11, %v102_v10 }
  0xb5   :  { %v160_v13 = vpop.f32.mrf.mxu2 }
  0xb6   :  { %v161_v14 = vadd.f32 %v160_v13, %v132_v12 }
  0xb8   :  { %168 = vst [vmem:[%s760_s4 + $0x10] sm:$0xff] %v161_v14 }
  0xb9   :  { %v255_v21 = vpop.f32.mrf.mxu3 }
  0xba   :  { %v105_v15 = vpop.f32.mrf.mxu0  ;;  %v134_v16 = vpop.f32.mrf.mxu1 }
  0xbb   :  { %v135_v17 = vadd.f32 %v134_v16, %v105_v15 }
  0xbe   :  { %v163_v18 = vpop.f32.mrf.mxu2 }
  0xbf   :  { %v164_v19 = vadd.f32 %v163_v18, %v135_v17 }
  0xc1   :  { %169 = vst [vmem:[%s760_s4 + $0x18] sm:$0xff] %v164_v19 }
  0xc2   :  { %v275_v20 = vpop.f32.mrf.mxu0 }
  0xc3   :  { %v276_v22 = vadd.f32 %v275_v20, %v255_v21 }
  0xc5   :  { %v295_v23 = vpop.f32.mrf.mxu1 }
  0xc6   :  { %v296_v24 = vadd.f32 %v295_v23, %v276_v22 }
  0xc7   :  { %v315_v25 = vpop.f32.mrf.mxu2 }
  0xc8   :  { %v316_v26 = vadd.f32 %v315_v25, %v296_v24 }
  0xca   :  { %318 = vst [vmem:[%s761_s5] sm:$0xff] %v316_v26 }

</bundles_post_ra>
